<compile_context>
chip_gen: v7x
topology: tpu7x:2x2x1
jax: 0.10.0
libtpu: 0.0.40
codegen_flags: <defaults>
</compile_context>

<pallas_src>
import functools

import jax
import jax.numpy as jnp
from jax.experimental import pallas as pl
from jax.experimental.pallas import tpu as pltpu

_LANE = 128


def _round_up(v, m):
    return (v + m - 1) // m * m


def _mlp_kernel(z_ref, x_ref,
                w1z_ref, w1x_ref, b1_ref,
                w2_ref, b2_ref,
                w3_ref, b3_ref,
                w4_ref, b4_ref,
                w5_ref, b5_ref,
                out_ref):
    """Fused 5-layer MLP on one batch tile.

    Matmul operands are bf16 (MXU native rate), accumulation and all
    elementwise math (bias add, ReLU) are f32.
    """
    cdt = w2_ref.dtype  # bf16 compute dtype for MXU operands

    # Layer 1 — split across (z, x) so the wrapper never materializes a concat.
    h = jnp.dot(z_ref[...].astype(cdt), w1z_ref[...],
                preferred_element_type=jnp.float32)
    h = h + jnp.dot(x_ref[...].astype(cdt), w1x_ref[...],
                    preferred_element_type=jnp.float32)
    h = jnp.maximum(h + b1_ref[...], 0.0)          # (TB, 128), f32

    def dense_relu(h, w_ref, b_ref):
        y = jnp.dot(h.astype(cdt), w_ref[...],
                    preferred_element_type=jnp.float32)
        return jnp.maximum(y + b_ref[...], 0.0)

    h = dense_relu(h, w2_ref, b2_ref)              # (TB, 256)
    h = dense_relu(h, w3_ref, b3_ref)              # (TB, 512)
    h = dense_relu(h, w4_ref, b4_ref)              # (TB, 1024)

    # Final layer: no ReLU; output padded to a lane-dense 128-wide slab.
    y = jnp.dot(h.astype(cdt), w5_ref[...],
                preferred_element_type=jnp.float32)
    out_ref[...] = (y + b5_ref[...]).astype(out_ref.dtype)


def generator_forward(z, x, packed, *, k, out_dim):
    """JAX wrapper reproducing Generator.forward(z, x) with packed params."""
    B, z_dim = z.shape
    x_dim = x.shape[1]
    out_pad = packed["w5"].shape[1]

    # Batch tiling: biggest tile that is a multiple of 8, capped at 512 rows.
    tile_b = min(512, _round_up(B, 8))
    b_pad = _round_up(B, tile_b)
    if b_pad != B:
        z = jnp.pad(z, ((0, b_pad - B), (0, 0)))
        x = jnp.pad(x, ((0, b_pad - B), (0, 0)))
    grid = (b_pad // tile_b,)

    def act_spec(d):
        return pl.BlockSpec((tile_b, d), lambda i: (i, 0))

    def resident_spec(arr):
        # Full-array block, same block index for every grid step -> weights
        # stay resident in VMEM (no re-DMA per batch tile).
        return pl.BlockSpec(arr.shape, lambda i: (0, 0))

    flops_per_row = 2 * (z_dim * 128 + x_dim * 128 + 128 * 256
                         + 256 * 512 + 512 * 1024 + 1024 * out_pad)
    weight_bytes = sum(int(v.size) * v.dtype.itemsize for v in packed.values())
    bytes_accessed = (weight_bytes
                      + b_pad * (z_dim + x_dim) * 4
                      + b_pad * out_pad * 4)

    out = pl.pallas_call(
        _mlp_kernel,
        out_shape=jax.ShapeDtypeStruct((b_pad, out_pad), jnp.float32),
        grid=grid,
        in_specs=[
            act_spec(z_dim),
            act_spec(x_dim),
            resident_spec(packed["w1z"]), resident_spec(packed["w1x"]),
            resident_spec(packed["b1"]),
            resident_spec(packed["w2"]), resident_spec(packed["b2"]),
            resident_spec(packed["w3"]), resident_spec(packed["b3"]),
            resident_spec(packed["w4"]), resident_spec(packed["b4"]),
            resident_spec(packed["w5"]), resident_spec(packed["b5"]),
        ],
        out_specs=act_spec(out_pad),
        compiler_params=pltpu.CompilerParams(
            dimension_semantics=("parallel",),
            vmem_limit_bytes=32 * 1024 * 1024),
        cost_estimate=pl.CostEstimate(
            flops=b_pad * flops_per_row,
            transcendentals=0,
            bytes_accessed=bytes_accessed),
    )(z, x,
      packed["w1z"], packed["w1x"], packed["b1"],
      packed["w2"], packed["b2"],
      packed["w3"], packed["b3"],
      packed["w4"], packed["b4"],
      packed["w5"], packed["b5"])

    theta = out[:B, :out_dim].reshape(-1, k, out_dim // k)
    return theta


def init_generator_params(key, z_dim, x_dim, theta_dim, k):
    """PyTorch-style uniform(+/- 1/sqrt(fan_in)) init.

    Weights stored as (in_dim, out_dim) f32; biases as (1, out_dim) f32.
    """
    dims = [z_dim + x_dim, 128, 256, 512, 1024, k * theta_dim]
    params = {}
    keys = jax.random.split(key, 2 * (len(dims) - 1))
    for i in range(len(dims) - 1):
        fan_in, fan_out = dims[i], dims[i + 1]
        bound = 1.0 / jnp.sqrt(jnp.float32(fan_in))
        wk, bk = keys[2 * i], keys[2 * i + 1]
        params[f"w{i+1}"] = jax.random.uniform(
            wk, (fan_in, fan_out), jnp.float32, minval=-bound, maxval=bound)
        params[f"b{i+1}"] = jax.random.uniform(
            bk, (1, fan_out), jnp.float32, minval=-bound, maxval=bound)
    return params


def pack_generator_params(params, z_dim):
    """One-time packing: bf16 weights, split W1, lane-pad the final layer."""
    bf16 = jnp.bfloat16
    out_dim = params["w5"].shape[1]
    out_pad = _round_up(max(out_dim, _LANE), _LANE)
    pad5 = out_pad - out_dim
    return {
        "w1z": params["w1"][:z_dim].astype(bf16),
        "w1x": params["w1"][z_dim:].astype(bf16),
        "b1": params["b1"],
        "w2": params["w2"].astype(bf16), "b2": params["b2"],
        "w3": params["w3"].astype(bf16), "b3": params["b3"],
        "w4": params["w4"].astype(bf16), "b4": params["b4"],
        "w5": jnp.pad(params["w5"], ((0, 0), (0, pad5))).astype(bf16),
        "b5": jnp.pad(params["b5"], ((0, 0), (0, pad5))),
    }


def _reference_forward_f32(z, x, params, k):
    """Pure-JAX f32 reference (exact module semantics)."""
    h = jnp.concatenate([z, x], axis=-1)
    for i in range(1, 5):
        h = jnp.maximum(h @ params[f"w{i}"] + params[f"b{i}"], 0.0)
    out = h @ params["w5"] + params["b5"]
    return out.reshape(-1, k, out.shape[1] // k)


def _reference_forward_bf16(z, x, params, k):
    """Pure-JAX reference mimicking the kernel's bf16-operand / f32-accum math."""
    bf16 = jnp.bfloat16
    h = jnp.concatenate([z, x], axis=-1)
    for i in range(1, 5):
        y = jnp.dot(h.astype(bf16), params[f"w{i}"].astype(bf16),
                    preferred_element_type=jnp.float32)
        h = jnp.maximum(y + params[f"b{i}"], 0.0)
    y = jnp.dot(h.astype(bf16), params["w5"].astype(bf16),
                preferred_element_type=jnp.float32)
    out = y + params["b5"]
    return out.reshape(-1, k, out.shape[1] // k)


if __name__ == "__main__":
    # Small shapes consistent with the module.
    batch = 8
    z_dim = 16
    x_dim = 16
    theta_dim = 4
    kmix = 4
    out_dim = kmix * theta_dim

    root = jax.random.PRNGKey(0)
    kp, kz, kx = jax.random.split(root, 3)

    params = init_generator_params(kp, z_dim, x_dim, theta_dim, kmix)
    packed = pack_generator_params(params, z_dim)
    z = jax.random.normal(kz, (batch, z_dim), jnp.float32)
    x = jax.random.normal(kx, (batch, x_dim), jnp.float32)

    fwd = jax.jit(functools.partial(generator_forward, k=kmix, out_dim=out_dim))
    theta = fwd(z, x, packed)
    theta = jax.block_until_ready(theta)

    assert theta.shape == (batch, kmix, theta_dim), theta.shape

    ref_bf16 = _reference_forward_bf16(z, x, params, kmix)
    assert jnp.allclose(theta, ref_bf16, atol=2e-3, rtol=2e-3), \
        "mismatch vs bf16-emulated reference"

    ref_f32 = _reference_forward_f32(z, x, params, kmix)
    assert jnp.allclose(theta, ref_f32, atol=1e-1, rtol=1e-1), \
        "mismatch vs f32 reference"

    print("KERNEL_OK")
</pallas_src>

<mosaic_0001>
module attributes {stable_mosaic.version = 11 : i64} {
  func.func @_mlp_kernel(%arg0: i32, %arg1: memref<8x16xf32, #tpu.memory_space<vmem>>, %arg2: memref<8x16xf32, #tpu.memory_space<vmem>>, %arg3: memref<16x128xbf16, #tpu.memory_space<vmem>>, %arg4: memref<16x128xbf16, #tpu.memory_space<vmem>>, %arg5: memref<1x128xf32, #tpu.memory_space<vmem>>, %arg6: memref<128x256xbf16, #tpu.memory_space<vmem>>, %arg7: memref<1x256xf32, #tpu.memory_space<vmem>>, %arg8: memref<256x512xbf16, #tpu.memory_space<vmem>>, %arg9: memref<1x512xf32, #tpu.memory_space<vmem>>, %arg10: memref<512x1024xbf16, #tpu.memory_space<vmem>>, %arg11: memref<1x1024xf32, #tpu.memory_space<vmem>>, %arg12: memref<1024x128xbf16, #tpu.memory_space<vmem>>, %arg13: memref<1x128xf32, #tpu.memory_space<vmem>>, %arg14: memref<8x128xf32, #tpu.memory_space<vmem>>) attributes {dimension_semantics = [#tpu.dimension_semantics<parallel>], iteration_bounds = array<i64: 1>, scalar_prefetch = 0 : i64, scratch_operands = 0 : i64, tpu.core_type = #tpu.core_type<tc>, window_params = [{transform_indices = @transform_0, window_bounds = array<i64: 8, 16>}, {transform_indices = @transform_1, window_bounds = array<i64: 8, 16>}, {pipeline_mode = #tpu.pipeline_mode<synchronous>, transform_indices = @transform_2, window_bounds = array<i64: 16, 128>}, {pipeline_mode = #tpu.pipeline_mode<synchronous>, transform_indices = @transform_3, window_bounds = array<i64: 16, 128>}, {pipeline_mode = #tpu.pipeline_mode<synchronous>, transform_indices = @transform_4, window_bounds = array<i64: 1, 128>}, {pipeline_mode = #tpu.pipeline_mode<synchronous>, transform_indices = @transform_5, window_bounds = array<i64: 128, 256>}, {pipeline_mode = #tpu.pipeline_mode<synchronous>, transform_indices = @transform_6, window_bounds = array<i64: 1, 256>}, {pipeline_mode = #tpu.pipeline_mode<synchronous>, transform_indices = @transform_7, window_bounds = array<i64: 256, 512>}, {pipeline_mode = #tpu.pipeline_mode<synchronous>, transform_indices = @transform_8, window_bounds = array<i64: 1, 512>}, {pipeline_mode = #tpu.pipeline_mode<synchronous>, transform_indices = @transform_9, window_bounds = array<i64: 512, 1024>}, {pipeline_mode = #tpu.pipeline_mode<synchronous>, transform_indices = @transform_10, window_bounds = array<i64: 1, 1024>}, {pipeline_mode = #tpu.pipeline_mode<synchronous>, transform_indices = @transform_11, window_bounds = array<i64: 1024, 128>}, {pipeline_mode = #tpu.pipeline_mode<synchronous>, transform_indices = @transform_12, window_bounds = array<i64: 1, 128>}, {transform_indices = @transform_13, window_bounds = array<i64: 8, 128>}]} {
    %c0 = arith.constant 0 : index
    %c0_0 = arith.constant 0 : index
    %0 = vector.load %arg1[%c0, %c0_0] : memref<8x16xf32, #tpu.memory_space<vmem>>, vector<8x16xf32>
    %1 = arith.truncf %0 : vector<8x16xf32> to vector<8x16xbf16>
    %c0_1 = arith.constant 0 : index
    %c0_2 = arith.constant 0 : index
    %2 = vector.load %arg3[%c0_1, %c0_2] : memref<16x128xbf16, #tpu.memory_space<vmem>>, vector<16x128xbf16>
    %cst = arith.constant dense<0.000000e+00> : vector<8x128xf32>
    %3 = tpu.matmul %1, %2, %cst {dimension_numbers = #tpu.dot_dimension_numbers<[1], [0], [0], [1], [0, 0, 1, 1], [], []>} : vector<8x16xbf16>, vector<16x128xbf16>, vector<8x128xf32> -> vector<8x128xf32>
    %c0_3 = arith.constant 0 : index
    %c0_4 = arith.constant 0 : index
    %4 = vector.load %arg2[%c0_3, %c0_4] : memref<8x16xf32, #tpu.memory_space<vmem>>, vector<8x16xf32>
    %5 = arith.truncf %4 : vector<8x16xf32> to vector<8x16xbf16>
    %c0_5 = arith.constant 0 : index
    %c0_6 = arith.constant 0 : index
    %6 = vector.load %arg4[%c0_5, %c0_6] : memref<16x128xbf16, #tpu.memory_space<vmem>>, vector<16x128xbf16>
    %cst_7 = arith.constant dense<0.000000e+00> : vector<8x128xf32>
    %7 = tpu.matmul %5, %6, %cst_7 {dimension_numbers = #tpu.dot_dimension_numbers<[1], [0], [0], [1], [0, 0, 1, 1], [], []>} : vector<8x16xbf16>, vector<16x128xbf16>, vector<8x128xf32> -> vector<8x128xf32>
    %8 = arith.addf %3, %7 : vector<8x128xf32>
    %c0_8 = arith.constant 0 : index
    %c0_9 = arith.constant 0 : index
    %9 = vector.load %arg5[%c0_8, %c0_9] : memref<1x128xf32, #tpu.memory_space<vmem>>, vector<1x128xf32>
    %10 = vector.broadcast %9 : vector<1x128xf32> to vector<8x128xf32>
    %11 = arith.addf %8, %10 : vector<8x128xf32>
    %cst_10 = arith.constant 0.000000e+00 : f32
    %12 = vector.broadcast %cst_10 : f32 to vector<8x128xf32>
    %13 = arith.maximumf %11, %12 : vector<8x128xf32>
    %14 = arith.truncf %13 : vector<8x128xf32> to vector<8x128xbf16>
    %c0_11 = arith.constant 0 : index
    %c0_12 = arith.constant 0 : index
    %15 = vector.load %arg6[%c0_11, %c0_12] : memref<128x256xbf16, #tpu.memory_space<vmem>>, vector<128x256xbf16>
    %cst_13 = arith.constant dense<0.000000e+00> : vector<8x256xf32>
    %16 = tpu.matmul %14, %15, %cst_13 {dimension_numbers = #tpu.dot_dimension_numbers<[1], [0], [0], [1], [0, 0, 1, 1], [], []>} : vector<8x128xbf16>, vector<128x256xbf16>, vector<8x256xf32> -> vector<8x256xf32>
    %c0_14 = arith.constant 0 : index
    %c0_15 = arith.constant 0 : index
    %17 = vector.load %arg7[%c0_14, %c0_15] : memref<1x256xf32, #tpu.memory_space<vmem>>, vector<1x256xf32>
    %18 = vector.broadcast %17 : vector<1x256xf32> to vector<8x256xf32>
    %19 = arith.addf %16, %18 : vector<8x256xf32>
    %cst_16 = arith.constant 0.000000e+00 : f32
    %20 = vector.broadcast %cst_16 : f32 to vector<8x256xf32>
    %21 = arith.maximumf %19, %20 : vector<8x256xf32>
    %22 = arith.truncf %21 : vector<8x256xf32> to vector<8x256xbf16>
    %c0_17 = arith.constant 0 : index
    %c0_18 = arith.constant 0 : index
    %23 = vector.load %arg8[%c0_17, %c0_18] : memref<256x512xbf16, #tpu.memory_space<vmem>>, vector<256x512xbf16>
    %cst_19 = arith.constant dense<0.000000e+00> : vector<8x512xf32>
    %24 = tpu.matmul %22, %23, %cst_19 {dimension_numbers = #tpu.dot_dimension_numbers<[1], [0], [0], [1], [0, 0, 1, 1], [], []>} : vector<8x256xbf16>, vector<256x512xbf16>, vector<8x512xf32> -> vector<8x512xf32>
    %c0_20 = arith.constant 0 : index
    %c0_21 = arith.constant 0 : index
    %25 = vector.load %arg9[%c0_20, %c0_21] : memref<1x512xf32, #tpu.memory_space<vmem>>, vector<1x512xf32>
    %26 = vector.broadcast %25 : vector<1x512xf32> to vector<8x512xf32>
    %27 = arith.addf %24, %26 : vector<8x512xf32>
    %cst_22 = arith.constant 0.000000e+00 : f32
    %28 = vector.broadcast %cst_22 : f32 to vector<8x512xf32>
    %29 = arith.maximumf %27, %28 : vector<8x512xf32>
    %30 = arith.truncf %29 : vector<8x512xf32> to vector<8x512xbf16>
    %c0_23 = arith.constant 0 : index
    %c0_24 = arith.constant 0 : index
    %31 = vector.load %arg10[%c0_23, %c0_24] : memref<512x1024xbf16, #tpu.memory_space<vmem>>, vector<512x1024xbf16>
    %cst_25 = arith.constant dense<0.000000e+00> : vector<8x1024xf32>
    %32 = tpu.matmul %30, %31, %cst_25 {dimension_numbers = #tpu.dot_dimension_numbers<[1], [0], [0], [1], [0, 0, 1, 1], [], []>} : vector<8x512xbf16>, vector<512x1024xbf16>, vector<8x1024xf32> -> vector<8x1024xf32>
    %c0_26 = arith.constant 0 : index
    %c0_27 = arith.constant 0 : index
    %33 = vector.load %arg11[%c0_26, %c0_27] : memref<1x1024xf32, #tpu.memory_space<vmem>>, vector<1x1024xf32>
    %34 = vector.broadcast %33 : vector<1x1024xf32> to vector<8x1024xf32>
    %35 = arith.addf %32, %34 : vector<8x1024xf32>
    %cst_28 = arith.constant 0.000000e+00 : f32
    %36 = vector.broadcast %cst_28 : f32 to vector<8x1024xf32>
    %37 = arith.maximumf %35, %36 : vector<8x1024xf32>
    %38 = arith.truncf %37 : vector<8x1024xf32> to vector<8x1024xbf16>
    %c0_29 = arith.constant 0 : index
    %c0_30 = arith.constant 0 : index
    %39 = vector.load %arg12[%c0_29, %c0_30] : memref<1024x128xbf16, #tpu.memory_space<vmem>>, vector<1024x128xbf16>
    %cst_31 = arith.constant dense<0.000000e+00> : vector<8x128xf32>
    %40 = tpu.matmul %38, %39, %cst_31 {dimension_numbers = #tpu.dot_dimension_numbers<[1], [0], [0], [1], [0, 0, 1, 1], [], []>} : vector<8x1024xbf16>, vector<1024x128xbf16>, vector<8x128xf32> -> vector<8x128xf32>
    %c0_32 = arith.constant 0 : index
    %c0_33 = arith.constant 0 : index
    %41 = vector.load %arg13[%c0_32, %c0_33] : memref<1x128xf32, #tpu.memory_space<vmem>>, vector<1x128xf32>
    %42 = vector.broadcast %41 : vector<1x128xf32> to vector<8x128xf32>
    %43 = arith.addf %40, %42 : vector<8x128xf32>
    %c0_34 = arith.constant 0 : index
    %c0_35 = arith.constant 0 : index
    %44 = vector.load %arg14[%c0_34, %c0_35] : memref<8x128xf32, #tpu.memory_space<vmem>>, vector<8x128xf32>
    tpu.vector_store %arg14[%c0_34, %c0_35], %43 {strides = array<i32>} : memref<8x128xf32, #tpu.memory_space<vmem>>, vector<8x128xf32>,
    return
  }
  func.func @transform_0(%arg0: i32) -> (i32, i32) {
    %c0_i32 = arith.constant 0 : i32
    %c0_i32_0 = arith.constant 0 : i32
    return %arg0, %c0_i32 : i32, i32
  }
  func.func @transform_1(%arg0: i32) -> (i32, i32) {
    %c0_i32 = arith.constant 0 : i32
    %c0_i32_0 = arith.constant 0 : i32
    return %arg0, %c0_i32 : i32, i32
  }
  func.func @transform_2(%arg0: i32) -> (i32, i32) {
    %c0_i32 = arith.constant 0 : i32
    %c0_i32_0 = arith.constant 0 : i32
    %c0_i32_1 = arith.constant 0 : i32
    return %c0_i32, %c0_i32_0 : i32, i32
  }
  func.func @transform_3(%arg0: i32) -> (i32, i32) {
    %c0_i32 = arith.constant 0 : i32
    %c0_i32_0 = arith.constant 0 : i32
    %c0_i32_1 = arith.constant 0 : i32
    return %c0_i32, %c0_i32_0 : i32, i32
  }
  func.func @transform_4(%arg0: i32) -> (i32, i32) {
    %c0_i32 = arith.constant 0 : i32
    %c0_i32_0 = arith.constant 0 : i32
    %c0_i32_1 = arith.constant 0 : i32
    return %c0_i32, %c0_i32_0 : i32, i32
  }
  func.func @transform_5(%arg0: i32) -> (i32, i32) {
    %c0_i32 = arith.constant 0 : i32
    %c0_i32_0 = arith.constant 0 : i32
    %c0_i32_1 = arith.constant 0 : i32
    return %c0_i32, %c0_i32_0 : i32, i32
  }
  func.func @transform_6(%arg0: i32) -> (i32, i32) {
    %c0_i32 = arith.constant 0 : i32
    %c0_i32_0 = arith.constant 0 : i32
    %c0_i32_1 = arith.constant 0 : i32
    return %c0_i32, %c0_i32_0 : i32, i32
  }
  func.func @transform_7(%arg0: i32) -> (i32, i32) {
    %c0_i32 = arith.constant 0 : i32
    %c0_i32_0 = arith.constant 0 : i32
    %c0_i32_1 = arith.constant 0 : i32
    return %c0_i32, %c0_i32_0 : i32, i32
  }
  func.func @transform_8(%arg0: i32) -> (i32, i32) {
    %c0_i32 = arith.constant 0 : i32
    %c0_i32_0 = arith.constant 0 : i32
    %c0_i32_1 = arith.constant 0 : i32
    return %c0_i32, %c0_i32_0 : i32, i32
  }
  func.func @transform_9(%arg0: i32) -> (i32, i32) {
    %c0_i32 = arith.constant 0 : i32
    %c0_i32_0 = arith.constant 0 : i32
    %c0_i32_1 = arith.constant 0 : i32
    return %c0_i32, %c0_i32_0 : i32, i32
  }
  func.func @transform_10(%arg0: i32) -> (i32, i32) {
    %c0_i32 = arith.constant 0 : i32
    %c0_i32_0 = arith.constant 0 : i32
    %c0_i32_1 = arith.constant 0 : i32
    return %c0_i32, %c0_i32_0 : i32, i32
  }
  func.func @transform_11(%arg0: i32) -> (i32, i32) {
    %c0_i32 = arith.constant 0 : i32
    %c0_i32_0 = arith.constant 0 : i32
    %c0_i32_1 = arith.constant 0 : i32
    return %c0_i32, %c0_i32_0 : i32, i32
  }
  func.func @transform_12(%arg0: i32) -> (i32, i32) {
    %c0_i32 = arith.constant 0 : i32
    %c0_i32_0 = arith.constant 0 : i32
    %c0_i32_1 = arith.constant 0 : i32
    return %c0_i32, %c0_i32_0 : i32, i32
  }
  func.func @transform_13(%arg0: i32) -> (i32, i32) {
    %c0_i32 = arith.constant 0 : i32
    %c0_i32_0 = arith.constant 0 : i32
    return %arg0, %c0_i32 : i32, i32
  }
}

</mosaic_0001>

<bundles_post_ra>
// kernel: generator_forward.1
= control target key start
LH: loop header
LB: loop body
LE: loop exit
PB: predicated region body
PF: predicated region fallthrough
CT: control target
= control target key end

     0   :  { %18 = vsyncpa [#allocation3], 0  ;;  %s4775_s0 = inlined_call_operand.hbm [shape: f32[8,16], index: 0, kind: input, shape index: {}]   ;;  %s4776_s1 = inlined_call_operand.hbm [shape: f32[8,16], index: 1, kind: input, shape index: {}]   ;;  %s4777_s2 = inlined_call_operand.vmem [shape: bf16[16,128], index: 2, kind: input, shape index: {}]   ;;  %s4778_s3 = inlined_call_operand.vmem [shape: bf16[16,128], index: 3, kind: input, shape index: {}]   ;;  %s4779_s4 = inlined_call_operand.hbm [shape: f32[1,128], index: 4, kind: input, shape index: {}]   ;;  %s4780_s5 = inlined_call_operand.hbm [shape: bf16[128,256], index: 5, kind: input, shape index: {}]   ;;  %s4781_s6 = inlined_call_operand.vmem [shape: f32[1,256], index: 6, kind: input, shape index: {}]   ;;  %s4782_s7 = inlined_call_operand.hbm [shape: bf16[256,512], index: 7, kind: input, shape index: {}]   ;;  %s4783_s8 = inlined_call_operand.hbm [shape: f32[1,512], index: 8, kind: input, shape index: {}]   ;;  %s4784_s9 = inlined_call_operand.hbm [shape: bf16[512,1024], index: 9, kind: input, shape index: {}]   ;;  %s4785_s10 = inlined_call_operand.hbm [shape: f32[1,1024], index: 10, kind: input, shape index: {}]   ;;  %s4786_s11 = inlined_call_operand.hbm [shape: bf16[1024,128], index: 11, kind: input, shape index: {}]   ;;  %s4787_s12 = inlined_call_operand.vmem [shape: f32[1,128], index: 12, kind: input, shape index: {}]   ;;  %s4788_s13 = inlined_call_operand.vmem [shape: f32[8,128], index: 13, kind: output, shape index: {}]  }
   0x1   :  { %19 = vsyncpa [#allocation5], 0 }
   0x2   :  { %20 = vsyncpa [#allocation8], 0 }
   0x3   :  { %21 = vsyncpa [#allocation11], 0 }
   0x4   :  { %22 = vsyncpa [#allocation14], 0  ;;  %s4482_s25 = smov [#allocation4]   ;;  %s4483_s27 = smov [#allocation7]  }
   0x5   :  { %s39_s26 = sshll.u32 %s4482_s25, 4  ;;  %s62_s28 = sshll.u32 %s4483_s27, 4  ;;  %s40_s26 = int_to_ptr.vmem [resolvable:$true] %s39_s26  ;;  %s4572_s28 = int_to_ptr.vmem [resolvable:$true] %s62_s28 }
   0x6   :  { %s4274_s14 = scalar_lea.hbm %s4776_s1, 128 }
   0x7   :  { %p4275_p0 = scmp.ne.s32.totalorder %s4776_s1, %s4274_s14  ;;  %p4278_p1 = scmp.lt.u32.totalorder %s4274_s14, %s4776_s1 }
   0x9   :  { %p4280_p2 = pnand %p4278_p1, %p4275_p0 }
   0xb   :  { %4283 = shalt.err (!%p4280_p2)
}
   0xc   :  { %s4284_s19 = scalar_lea.vmem %s40_s26, 128  ;;  %p4289_p4 = scmp.lt.s32.totalorder %s40_s26, %s40_s26 }
   0xd   :  { %p4285_p3 = scmp.ne.s32.totalorder %s40_s26, %s4284_s19  ;;  %p4290_p5 = scmp.lt.s32.totalorder %s4284_s19, %s4284_s19 }
   0xf   :  { %p4291_p6 = por %p4290_p5, %p4289_p4 }
  0x11   :  { %p4292_p7 = pnand %p4291_p6, %p4285_p3 }
  0x13   :  { %4295 = shalt.err (!%p4292_p7)
}
  0x14   :  { %42 = dma.hbm_to_vmem [thread:$0]  %s4776_s1, 128, %s40_s26, [#allocation5]  }
  0x15   :  { %s4296_s24 = scalar_lea.hbm %s4780_s5, 2048 }
  0x16   :  { %p4297_p8 = scmp.ne.s32.totalorder %s4780_s5, %s4296_s24  ;;  %p4300_p9 = scmp.lt.u32.totalorder %s4296_s24, %s4780_s5 }
  0x18   :  { %p4302_p10 = pnand %p4300_p9, %p4297_p8 }
  0x1a   :  { %4305 = shalt.err (!%p4302_p10)
}
  0x1b   :  { %s4306_s14 = scalar_lea.vmem %s4572_s28, 2048  ;;  %p4311_p12 = scmp.lt.s32.totalorder %s4572_s28, %s4572_s28 }
  0x1c   :  { %p4307_p11 = scmp.ne.s32.totalorder %s4572_s28, %s4306_s14  ;;  %p4312_p13 = scmp.lt.s32.totalorder %s4306_s14, %s4306_s14 }
  0x1e   :  { %p4313_p0 = por %p4312_p13, %p4311_p12 }
  0x20   :  { %p4314_p1 = pnand %p4313_p0, %p4307_p11 }
  0x22   :  { %4317 = shalt.err (!%p4314_p1)
}
  0x23   :  { %s4484_s1 = smov 128   ;;  %s4485_s26 = smov 8  }
  0x24   :  { %68 = dma.hbm_to_vmem [thread:$0]  %s4780_s5, 2048, %s4572_s28, [#allocation8], %s4484_s1, %s4484_s1, %s4485_s26  }
  0x25   :  { %s4486_s17 = smov [#allocation10]   ;;  %s4487_s19 = smov [#allocation13]  }
  0x26   :  { %s89_s18 = sshll.u32 %s4486_s17, 4  ;;  %s111_s20 = sshll.u32 %s4487_s19, 4  ;;  %s90_s18 = int_to_ptr.vmem [resolvable:$true] %s89_s18  ;;  %s112_s20 = int_to_ptr.vmem [resolvable:$true] %s111_s20 }
  0x27   :  { %s4318_s23 = scalar_lea.hbm %s4783_s8, 64 }
  0x28   :  { %p4319_p2 = scmp.ne.s32.totalorder %s4783_s8, %s4318_s23  ;;  %p4322_p3 = scmp.lt.u32.totalorder %s4318_s23, %s4783_s8 }
  0x2a   :  { %p4324_p4 = pnand %p4322_p3, %p4319_p2 }
  0x2c   :  { %4327 = shalt.err (!%p4324_p4)
}
  0x2d   :  { %s4328_s5 = scalar_lea.vmem %s90_s18, 64  ;;  %p4333_p6 = scmp.lt.s32.totalorder %s90_s18, %s90_s18 }
  0x2e   :  { %p4329_p5 = scmp.ne.s32.totalorder %s90_s18, %s4328_s5  ;;  %p4334_p7 = scmp.lt.s32.totalorder %s4328_s5, %s4328_s5 }
  0x30   :  { %p4335_p8 = por %p4334_p7, %p4333_p6 }
  0x32   :  { %p4336_p9 = pnand %p4335_p8, %p4329_p5 }
  0x34   :  { %4339 = shalt.err (!%p4336_p9)
}
  0x35   :  { %92 = dma.hbm_to_vmem [thread:$0]  %s4783_s8, 64, %s90_s18, [#allocation11]  }
  0x36   :  { %s4340_s26 = scalar_lea.hbm %s4785_s10, 128 }
  0x37   :  { %p4341_p10 = scmp.ne.s32.totalorder %s4785_s10, %s4340_s26  ;;  %p4344_p11 = scmp.lt.u32.totalorder %s4340_s26, %s4785_s10 }
  0x39   :  { %p4346_p12 = pnand %p4344_p11, %p4341_p10 }
  0x3b   :  { %4349 = shalt.err (!%p4346_p12)
}
  0x3c   :  { %s4350_s21 = scalar_lea.vmem %s112_s20, 128  ;;  %p4355_p0 = scmp.lt.s32.totalorder %s112_s20, %s112_s20 }
  0x3d   :  { %p4351_p13 = scmp.ne.s32.totalorder %s112_s20, %s4350_s21  ;;  %p4356_p1 = scmp.lt.s32.totalorder %s4350_s21, %s4350_s21 }
  0x3f   :  { %p4357_p2 = por %p4356_p1, %p4355_p0 }
  0x41   :  { %p4358_p3 = pnand %p4357_p2, %p4351_p13 }
  0x43   :  { %4361 = shalt.err (!%p4358_p3)
}
  0x44   :  { %114 = dma.hbm_to_vmem [thread:$0]  %s4785_s10, 128, %s112_s20, [#allocation14]  }
  0x45   :  { %s4488_s22 = smov [#allocation2]   ;;  %s4489_s24 = smov [#allocation6]  }
  0x46   :  { %s29_s23 = sshll.u32 %s4488_s22, 4  ;;  %s53_s25 = sshll.u32 %s4489_s24, 4  ;;  %s30_s23 = int_to_ptr.vmem [resolvable:$true] %s29_s23  ;;  %s54_s25 = int_to_ptr.vmem [resolvable:$true] %s53_s25 }
  0x47   :  { %s4362_s5 = scalar_lea.hbm %s4775_s0, 128 }
  0x48   :  { %p4363_p4 = scmp.ne.s32.totalorder %s4775_s0, %s4362_s5  ;;  %p4366_p5 = scmp.lt.u32.totalorder %s4362_s5, %s4775_s0 }
  0x4a   :  { %p4368_p6 = pnand %p4366_p5, %p4363_p4 }
  0x4c   :  { %4371 = shalt.err (!%p4368_p6)
}
  0x4d   :  { %s4372_s10 = scalar_lea.vmem %s30_s23, 128  ;;  %p4377_p8 = scmp.lt.s32.totalorder %s30_s23, %s30_s23 }
  0x4e   :  { %p4373_p7 = scmp.ne.s32.totalorder %s30_s23, %s4372_s10  ;;  %p4378_p9 = scmp.lt.s32.totalorder %s4372_s10, %s4372_s10 }
  0x50   :  { %p4379_p10 = por %p4378_p9, %p4377_p8 }
  0x52   :  { %p4380_p11 = pnand %p4379_p10, %p4373_p7 }
  0x54   :  { %4383 = shalt.err (!%p4380_p11)
}
  0x55   :  { %32 = dma.hbm_to_vmem [thread:$0]  %s4775_s0, 128, %s30_s23, [#allocation3]  }
  0x56   :  { %s4384_s17 = scalar_lea.hbm %s4779_s4, 16 }
  0x57   :  { %p4385_p12 = scmp.ne.s32.totalorder %s4779_s4, %s4384_s17  ;;  %p4388_p13 = scmp.lt.u32.totalorder %s4384_s17, %s4779_s4 }
  0x59   :  { %p4390_p0 = pnand %p4388_p13, %p4385_p12 }
  0x5b   :  { %4393 = shalt.err (!%p4390_p0)
}
  0x5c   :  { %s4394_s22 = scalar_lea.vmem %s54_s25, 16  ;;  %s4398_s24 = scalar_lea.vmem %s54_s25, 32 }
  0x5d   :  { %p4395_p1 = scmp.ne.s32.totalorder %s54_s25, %s4394_s22  ;;  %p4399_p2 = scmp.lt.s32.totalorder %s54_s25, %s54_s25 }
  0x5e   :  { %p4400_p3 = scmp.lt.s32.totalorder %s4398_s24, %s4394_s22 }
  0x60   :  { %p4401_p4 = por %p4400_p3, %p4399_p2 }
  0x62   :  { %p4402_p5 = pnand %p4401_p4, %p4395_p1 }
  0x64   :  { %4405 = shalt.err (!%p4402_p5)
}
  0x65   :  { %56 = dma.hbm_to_vmem [thread:$0]  %s4779_s4, 16, %s54_s25, [#allocation5]  }
  0x66   :  { %s4490_s27 = smov [#allocation9]   ;;  %s4406_s30 = scalar_lea.hbm %s4782_s7, 8192 }
  0x67   :  { %s76_s29 = sshll.u32 %s4490_s27, 4  ;;  %p4407_p6 = scmp.ne.s32.totalorder %s4782_s7, %s4406_s30  ;;  %s77_s29 = int_to_ptr.vmem [resolvable:$true] %s76_s29 }
  0x68   :  { %p4410_p7 = scmp.lt.u32.totalorder %s4406_s30, %s4782_s7 }
  0x6a   :  { %p4412_p8 = pnand %p4410_p7, %p4407_p6 }
  0x6c   :  { %4415 = shalt.err (!%p4412_p8)
}
  0x6d   :  { %s4416_s26 = scalar_lea.vmem %s77_s29, 8192  ;;  %p4421_p10 = scmp.lt.s32.totalorder %s77_s29, %s77_s29 }
  0x6e   :  { %p4417_p9 = scmp.ne.s32.totalorder %s77_s29, %s4416_s26  ;;  %p4422_p11 = scmp.lt.s32.totalorder %s4416_s26, %s4416_s26 }
  0x70   :  { %p4423_p12 = por %p4422_p11, %p4421_p10 }
  0x72   :  { %p4424_p13 = pnand %p4423_p12, %p4417_p9 }
  0x74   :  { %4427 = shalt.err (!%p4424_p13)
}
  0x75   :  { %s4491_s4 = smov 256   ;;  %s4492_s25 = smov 16  }
  0x76   :  { %82 = dma.hbm_to_vmem [thread:$0]  %s4782_s7, 8192, %s77_s29, [#allocation8], %s4491_s4, %s4491_s4, %s4492_s25  }
  0x77   :  { %s4493_s17 = smov [#allocation12]   ;;  %s4428_s18 = scalar_lea.hbm %s4784_s9, 32768 }
  0x78   :  { %s98_s19 = sshll.u32 %s4493_s17, 4  ;;  %p4429_p0 = scmp.ne.s32.totalorder %s4784_s9, %s4428_s18  ;;  %s99_s19 = int_to_ptr.vmem [resolvable:$true] %s98_s19 }
  0x79   :  { %p4432_p1 = scmp.lt.u32.totalorder %s4428_s18, %s4784_s9 }
  0x7b   :  { %p4434_p2 = pnand %p4432_p1, %p4429_p0 }
  0x7d   :  { %4437 = shalt.err (!%p4434_p2)
}
  0x7e   :  { %s4438_s27 = scalar_lea.vmem %s99_s19, 32768  ;;  %p4443_p4 = scmp.lt.s32.totalorder %s99_s19, %s99_s19 }
  0x7f   :  { %p4439_p3 = scmp.ne.s32.totalorder %s99_s19, %s4438_s27  ;;  %p4444_p5 = scmp.lt.s32.totalorder %s4438_s27, %s4438_s27 }
  0x81   :  { %p4445_p6 = por %p4444_p5, %p4443_p4 }
  0x83   :  { %p4446_p7 = pnand %p4445_p6, %p4439_p3 }
  0x85   :  { %4449 = shalt.err (!%p4446_p7)
}
  0x86   :  { %s4494_s7 = smov 512   ;;  %s4495_s29 = smov 32  }
  0x87   :  { %104 = dma.hbm_to_vmem [thread:$0]  %s4784_s9, 32768, %s99_s19, [#allocation11], %s4494_s7, %s4494_s7, %s4495_s29  }
  0x88   :  { %s4496_s30 = smov [#allocation15]   ;;  %s4450_s20 = scalar_lea.hbm %s4786_s11, 8192 }
  0x89   :  { %s120_s14 = sshll.u32 %s4496_s30, 4  ;;  %p4451_p8 = scmp.ne.s32.totalorder %s4786_s11, %s4450_s20  ;;  %s121_s14 = int_to_ptr.vmem [resolvable:$true] %s120_s14 }
  0x8a   :  { %p4454_p9 = scmp.lt.u32.totalorder %s4450_s20, %s4786_s11 }
  0x8c   :  { %p4456_p10 = pnand %p4454_p9, %p4451_p8 }
  0x8e   :  { %4459 = shalt.err (!%p4456_p10)
}
  0x8f   :  { %s4460_s16 = scalar_lea.vmem %s121_s14, 8192  ;;  %p4465_p12 = scmp.lt.s32.totalorder %s121_s14, %s121_s14 }
  0x90   :  { %p4461_p11 = scmp.ne.s32.totalorder %s121_s14, %s4460_s16  ;;  %p4466_p13 = scmp.lt.s32.totalorder %s4460_s16, %s4460_s16 }
  0x92   :  { %p4467_p0 = por %p4466_p13, %p4465_p12 }
  0x94   :  { %p4468_p1 = pnand %p4467_p0, %p4461_p11 }
  0x96   :  { %4471 = shalt.err (!%p4468_p1)
}
  0x97   :  { %s4497_s9 = smov 64   ;;  %s4498_s17 = smov 4  }
  0x98   :  { %126 = dma.hbm_to_vmem [thread:$0]  %s4786_s11, 8192, %s121_s14, [#allocation14], %s4497_s9, %s4497_s9, %s4498_s17  }
  0x99   :  { %4472 = dma.done.wait [#allocation3], 128  }
  0x9a   :  { %4473 = vsyncadd [#allocation3], 4294967168 }
  0x9b   :  { %4474 = dma.done.wait [#allocation5], 144  }
  0x9c   :  { %4475 = vsyncadd [#allocation5], 4294967152 }
  0x9d   :  { %4476 = dma.done.wait [#allocation8], 10240  }
  0x9e   :  { %4477 = vsyncadd [#allocation8], 4294957056 }
  0x9f   :  { %4478 = dma.done.wait [#allocation11], 32832  }
  0xa0   :  { %4479 = vsyncadd [#allocation11], 4294934464 }
  0xa1   :  { %4480 = dma.done.wait [#allocation14], 8320  }
  0xa2   :  { %4481 = vsyncadd [#allocation14], 4294958976  ;;  %v4499_v0 = vmov 0.0   ;;  %vm4500_vm0 = vmmov 0   ;;  %v4088_v1 = vld [vmem:[%s4778_s3] sm:$0xff]   ;;  %v161_v2 = vld [vmem:[#allocation4] sm:$0xff] }
  0xa3   :  { %4032 = vmatprep.subr.bf16.mxu1 %v4499_v0  ;;  %4034 = vmatprep.mubr.msk.bf16.mxu1 %vm4500_vm0, %v4499_v0  ;;  %v162_v3 = vpack.c.bf16 %v161_v2, %v161_v2  ;;  %vm171_vm1 = vcmask 130048   ;;  %v4089_v4 = vld [vmem:[%s4777_s2] sm:$0xff]   ;;  %v4092_v6 = vld [vmem:[#allocation7] ss:$8 sps:$4 sm:$0xff]   ;;  %v4501_v23 = vmov 0  }
  0xa4   :  { %4033 = vmatpush3.bf16.msra.mxu1 %v4088_v1  ;;  %v4090_v5 = vld [vmem:[#allocation7 + $0x4] ss:$8 sps:$4 sm:$0xff]   ;;  %v4093_v7 = vld [vmem:[#allocation7 + $0x14] ss:$8 sps:$4 sm:$0xff]   ;;  %v4095_v9 = vld [vmem:[#allocation7 + $0x10] ss:$8 sps:$4 sm:$0xff]   ;;  %414 = vmatprep.mubr.bf16.mxu0 %v4501_v23 }
  0xa5   :  { %4038 = vmatprep.subr.bf16.mxu1 %v4499_v0  ;;  %382 = vmatprep.subr.bf16.mxu0 %v4090_v5  ;;  %v157_v8 = vld [vmem:[#allocation2] sm:$0xff]  ;;  %v4098_v12 = vld [vmem:[#allocation7 + $0x20] ss:$8 sps:$4 sm:$0xff]   ;;  %v3538_v58 = vld [vmem:[#allocation6] ss:$0 sm:$0xff] }
  0xa6   :  { %383 = vmatpush1.bf16.msra.mxu0 %v4092_v6  ;;  %v4096_v10 = vld [vmem:[#allocation7 + $0x24] ss:$8 sps:$4 sm:$0xff]   ;;  %v158_v11 = vpack.c.bf16 %v157_v8, %v157_v8  ;;  %v4099_v13 = vld [vmem:[#allocation7 + $0x34] ss:$8 sps:$4 sm:$0xff]   ;;  %v4101_v14 = vld [vmem:[#allocation7 + $0x30] ss:$8 sps:$4 sm:$0xff]  }
  0xa7   :  { %4035 = vmatmul.mubr.msk.bf16.vlgmr.msra.gmra.mrb[0].mxu1 %vm171_vm1, %v162_v3  ;;  %384 = vmatprep.subr.bf16.mxu0 %v4093_v7  ;;  %v4102_v15 = vld [vmem:[#allocation7 + $0x44] ss:$8 sps:$4 sm:$0xff]   ;;  %v4104_v16 = vld [vmem:[#allocation7 + $0x40] ss:$8 sps:$4 sm:$0xff]   ;;  %v4105_v17 = vld [vmem:[#allocation7 + $0x54] ss:$8 sps:$4 sm:$0xff]  }
  0xa8   :  { %4039 = vmatpush3.bf16.msra.mxu1 %v4089_v4  ;;  %4040 = vmatprep.mubr.msk.bf16.mxu1 %vm4500_vm0, %v4499_v0  ;;  %v4107_v18 = vld [vmem:[#allocation7 + $0x50] ss:$8 sps:$4 sm:$0xff]   ;;  %v4108_v19 = vld [vmem:[#allocation7 + $0x64] ss:$8 sps:$4 sm:$0xff]   ;;  %v4110_v20 = vld [vmem:[#allocation7 + $0x60] ss:$8 sps:$4 sm:$0xff]  }
  0xa9   :  { %v4111_v21 = vld [vmem:[#allocation7 + $0x74] ss:$8 sps:$4 sm:$0xff]   ;;  %v4113_v22 = vld [vmem:[#allocation7 + $0x70] ss:$8 sps:$4 sm:$0xff]  }
  0xaa   :  { %385 = vmatpush1.bf16.msra.mxu0 %v4095_v9  ;;  %v4114_v24 = vld [vmem:[#allocation9] ss:$16 sps:$4 sm:$0xff]   ;;  %v4116_v25 = vld [vmem:[#allocation9 + $0x4] ss:$16 sps:$4 sm:$0xff]   ;;  %v4119_v26 = vld [vmem:[#allocation9 + $0xc] ss:$16 sps:$4 sm:$0xff]  }
  0xab   :  { %386 = vmatprep.subr.bf16.mxu0 %v4096_v10  ;;  %v4122_v27 = vld [vmem:[#allocation9 + $0x24] ss:$16 sps:$4 sm:$0xff]   ;;  %833 = vmatprep.subr.bf16.mxu1 %v4116_v25  ;;  %v4120_v28 = vld [vmem:[#allocation9 + $0x20] ss:$16 sps:$4 sm:$0xff]   ;;  %v4117_v1 = vld [vmem:[#allocation9 + $0x8] ss:$16 sps:$4 sm:$0xff]  }
  0xac   :  { %v4128_v29 = vld [vmem:[#allocation9 + $0x44] ss:$16 sps:$4 sm:$0xff]   ;;  %v4126_v30 = vld [vmem:[#allocation9 + $0x40] ss:$16 sps:$4 sm:$0xff]   ;;  %v4125_v3 = vld [vmem:[#allocation9 + $0x2c] ss:$16 sps:$4 sm:$0xff]  }
  0xad   :  { %v4134_v31 = vld [vmem:[#allocation9 + $0x64] ss:$16 sps:$4 sm:$0xff]   ;;  %v4132_v32 = vld [vmem:[#allocation9 + $0x60] ss:$16 sps:$4 sm:$0xff]   ;;  %v4123_v4 = vld [vmem:[#allocation9 + $0x28] ss:$16 sps:$4 sm:$0xff]  }
  0xae   :  { %387 = vmatpush1.bf16.msra.mxu0 %v4098_v12  ;;  %v4140_v33 = vld [vmem:[#allocation9 + $0x84] ss:$16 sps:$4 sm:$0xff]   ;;  %v4138_v34 = vld [vmem:[#allocation9 + $0x80] ss:$16 sps:$4 sm:$0xff]   ;;  %v4131_v5 = vld [vmem:[#allocation9 + $0x4c] ss:$16 sps:$4 sm:$0xff]  }
  0xaf   :  { %4041 = vmatmul.mubr.msk.bf16.vlgmr.msra.gmra.mrb[4].mxu1 %vm171_vm1, %v158_v11  ;;  %388 = vmatprep.subr.bf16.mxu0 %v4099_v13  ;;  %v4146_v35 = vld [vmem:[#allocation9 + $0xa4] ss:$16 sps:$4 sm:$0xff]   ;;  %v4144_v36 = vld [vmem:[#allocation9 + $0xa0] ss:$16 sps:$4 sm:$0xff]   ;;  %v4129_v6 = vld [vmem:[#allocation9 + $0x48] ss:$16 sps:$4 sm:$0xff]  }
  0xb0   :  { %834 = vmatpush1.bf16.msra.mxu1 %v4114_v24  ;;  %v4152_v37 = vld [vmem:[#allocation9 + $0xc4] ss:$16 sps:$4 sm:$0xff]   ;;  %v4150_v38 = vld [vmem:[#allocation9 + $0xc0] ss:$16 sps:$4 sm:$0xff]   ;;  %v4137_v7 = vld [vmem:[#allocation9 + $0x6c] ss:$16 sps:$4 sm:$0xff]  }
  0xb1   :  { %835 = vmatprep.subr.bf16.mxu1 %v4122_v27  ;;  %v4158_v39 = vld [vmem:[#allocation9 + $0xe4] ss:$16 sps:$4 sm:$0xff]   ;;  %v4156_v40 = vld [vmem:[#allocation9 + $0xe0] ss:$16 sps:$4 sm:$0xff]   ;;  %v4135_v8 = vld [vmem:[#allocation9 + $0x68] ss:$16 sps:$4 sm:$0xff]  }
  0xb2   :  { %389 = vmatpush1.bf16.msra.mxu0 %v4101_v14  ;;  %v4164_v41 = vld [vmem:[#allocation9 + $0x104] ss:$16 sps:$4 sm:$0xff]   ;;  %v4162_v42 = vld [vmem:[#allocation9 + $0x100] ss:$16 sps:$4 sm:$0xff]   ;;  %v4143_v9 = vld [vmem:[#allocation9 + $0x8c] ss:$16 sps:$4 sm:$0xff]  }
  0xb3   :  { %390 = vmatprep.subr.bf16.mxu0 %v4102_v15  ;;  %v4170_v43 = vld [vmem:[#allocation9 + $0x124] ss:$16 sps:$4 sm:$0xff]   ;;  %v4168_v44 = vld [vmem:[#allocation9 + $0x120] ss:$16 sps:$4 sm:$0xff]   ;;  %v4141_v10 = vld [vmem:[#allocation9 + $0x88] ss:$16 sps:$4 sm:$0xff]  }
  0xb4   :  { %836 = vmatpush1.bf16.msra.mxu1 %v4120_v28  ;;  %v4176_v45 = vld [vmem:[#allocation9 + $0x144] ss:$16 sps:$4 sm:$0xff]   ;;  %v4174_v46 = vld [vmem:[#allocation9 + $0x140] ss:$16 sps:$4 sm:$0xff]   ;;  %v4149_v11 = vld [vmem:[#allocation9 + $0xac] ss:$16 sps:$4 sm:$0xff]  }
  0xb5   :  { %837 = vmatprep.subr.bf16.mxu1 %v4128_v29  ;;  %v4182_v47 = vld [vmem:[#allocation9 + $0x164] ss:$16 sps:$4 sm:$0xff]   ;;  %v4180_v48 = vld [vmem:[#allocation9 + $0x160] ss:$16 sps:$4 sm:$0xff]   ;;  %v4147_v12 = vld [vmem:[#allocation9 + $0xa8] ss:$16 sps:$4 sm:$0xff]  }
  0xb6   :  { %391 = vmatpush1.bf16.msra.mxu0 %v4104_v16  ;;  %v4188_v49 = vld [vmem:[#allocation9 + $0x184] ss:$16 sps:$4 sm:$0xff]   ;;  %v4186_v50 = vld [vmem:[#allocation9 + $0x180] ss:$16 sps:$4 sm:$0xff]   ;;  %v4155_v13 = vld [vmem:[#allocation9 + $0xcc] ss:$16 sps:$4 sm:$0xff]  }
  0xb7   :  { %392 = vmatprep.subr.bf16.mxu0 %v4105_v17  ;;  %v4194_v51 = vld [vmem:[#allocation9 + $0x1a4] ss:$16 sps:$4 sm:$0xff]   ;;  %v4192_v52 = vld [vmem:[#allocation9 + $0x1a0] ss:$16 sps:$4 sm:$0xff]   ;;  %v4153_v14 = vld [vmem:[#allocation9 + $0xc8] ss:$16 sps:$4 sm:$0xff]  }
  0xb8   :  { %838 = vmatpush1.bf16.msra.mxu1 %v4126_v30  ;;  %v4161_v15 = vld [vmem:[#allocation9 + $0xec] ss:$16 sps:$4 sm:$0xff]   ;;  %v4159_v16 = vld [vmem:[#allocation9 + $0xe8] ss:$16 sps:$4 sm:$0xff]   ;;  %v4200_v29 = vld [vmem:[#allocation9 + $0x1c4] ss:$16 sps:$4 sm:$0xff]  }
  0xb9   :  { %839 = vmatprep.subr.bf16.mxu1 %v4134_v31  ;;  %v4167_v17 = vld [vmem:[#allocation9 + $0x10c] ss:$16 sps:$4 sm:$0xff]   ;;  %v4183_v24 = vld [vmem:[#allocation9 + $0x168] ss:$16 sps:$4 sm:$0xff]   ;;  %v4198_v31 = vld [vmem:[#allocation9 + $0x1c0] ss:$16 sps:$4 sm:$0xff]  }
  0xba   :  { %393 = vmatpush1.bf16.msra.mxu0 %v4107_v18  ;;  %v4165_v18 = vld [vmem:[#allocation9 + $0x108] ss:$16 sps:$4 sm:$0xff]   ;;  %v4185_v23 = vld [vmem:[#allocation9 + $0x16c] ss:$16 sps:$4 sm:$0xff]  }
  0xbb   :  { %394 = vmatprep.subr.bf16.mxu0 %v4108_v19  ;;  %v4173_v19 = vld [vmem:[#allocation9 + $0x12c] ss:$16 sps:$4 sm:$0xff]   ;;  %v4195_v28 = vld [vmem:[#allocation9 + $0x1a8] ss:$16 sps:$4 sm:$0xff]  }
  0xbc   :  { %840 = vmatpush1.bf16.msra.mxu1 %v4132_v32  ;;  %v4191_v25 = vld [vmem:[#allocation9 + $0x18c] ss:$16 sps:$4 sm:$0xff]   ;;  %v4201_v32 = vld [vmem:[#allocation9 + $0x1c8] ss:$16 sps:$4 sm:$0xff]  }
  0xbd   :  { %841 = vmatprep.subr.bf16.mxu1 %v4140_v33  ;;  %v4197_v27 = vld [vmem:[#allocation9 + $0x1ac] ss:$16 sps:$4 sm:$0xff]   ;;  %v4206_v33 = vld [vmem:[#allocation9 + $0x1e4] ss:$16 sps:$4 sm:$0xff]  }
  0xbe   :  { %395 = vmatpush1.bf16.msra.mxu0 %v4110_v20  ;;  %v4171_v20 = vld [vmem:[#allocation9 + $0x128] ss:$16 sps:$4 sm:$0xff]   ;;  %v4203_v30 = vld [vmem:[#allocation9 + $0x1cc] ss:$16 sps:$4 sm:$0xff]  }
  0xbf   :  { %396 = vmatprep.subr.bf16.mxu0 %v4111_v21  ;;  %v4179_v21 = vld [vmem:[#allocation9 + $0x14c] ss:$16 sps:$4 sm:$0xff]  }
  0xc0   :  { %842 = vmatpush1.bf16.msra.mxu1 %v4138_v34  ;;  %v4209_v34 = vld [vmem:[#allocation9 + $0x1ec] ss:$16 sps:$4 sm:$0xff]  }
  0xc1   :  { %843 = vmatprep.subr.bf16.mxu1 %v4146_v35  ;;  %v4204_v35 = vld [vmem:[#allocation9 + $0x1e0] ss:$16 sps:$4 sm:$0xff]  }
  0xc2   :  { %397 = vmatpush1.bf16.msra.mxu0 %v4113_v22  ;;  %v4177_v22 = vld [vmem:[#allocation9 + $0x148] ss:$16 sps:$4 sm:$0xff]  }
  0xc3   :  { %874 = vmatprep.subr.bf16.mxu0 %v4119_v26  ;;  %v4189_v26 = vld [vmem:[#allocation9 + $0x188] ss:$16 sps:$4 sm:$0xff]  }
  0xc4   :  { %844 = vmatpush1.bf16.msra.mxu1 %v4144_v36  ;;  %v4207_v36 = vld [vmem:[#allocation9 + $0x1e8] ss:$16 sps:$4 sm:$0xff]  }
  0xc5   :  { %845 = vmatprep.subr.bf16.mxu1 %v4152_v37  ;;  %v923_v37 = vld [vmem:[#allocation12] sm:$0xff] }
  0xc8   :  { %846 = vmatpush1.bf16.msra.mxu1 %v4150_v38  ;;  %v927_v38 = vld [vmem:[#allocation12 + $0x20] sm:$0xff] }
  0xc9   :  { %847 = vmatprep.subr.bf16.mxu1 %v4158_v39  ;;  %v924_v39 = vld [vmem:[#allocation12 + $0x8] sm:$0xff] }
  0xcc   :  { %848 = vmatpush1.bf16.msra.mxu1 %v4156_v40  ;;  %v3619_v40 = vcombine.low %v923_v37, %v927_v38 }
  0xcd   :  { %849 = vmatprep.subr.bf16.mxu1 %v4164_v41  ;;  %v3620_v41 = vcombine.high %v923_v37, %v927_v38  ;;  %v975_v37 = vld [vmem:[#allocation12 + $0x1a0] sm:$0xff]  ;;  %v972_v38 = vld [vmem:[#allocation12 + $0x188] sm:$0xff] }
  0xd0   :  { %850 = vmatpush1.bf16.msra.mxu1 %v4162_v42  ;;  %v928_v42 = vld [vmem:[#allocation12 + $0x28] sm:$0xff] }
  0xd1   :  { %851 = vmatprep.subr.bf16.mxu1 %v4170_v43  ;;  %v3621_v43 = vcombine.low %v924_v39, %v928_v42 }
  0xd4   :  { %852 = vmatpush1.bf16.msra.mxu1 %v4168_v44  ;;  %v3622_v44 = vcombine.high %v924_v39, %v928_v42  ;;  %v976_v39 = vld [vmem:[#allocation12 + $0x1a8] sm:$0xff] }
  0xd5   :  { %853 = vmatprep.subr.bf16.mxu1 %v4176_v45  ;;  %v292_v45 = vlaneseq }
  0xd8   :  { %854 = vmatpush1.bf16.msra.mxu1 %v4174_v46  ;;  %v4695_v46 = vshrl.u32 %v292_v45, 7  ;;  %v983_v45 = vld [vmem:[#allocation12 + $0x1e0] sm:$0xff] }
  0xd9   :  { %855 = vmatprep.subr.bf16.mxu1 %v4182_v47 }
  0xda   :  { %v4698_v47 = vsub.s32 0, %v4695_v46 }
  0xdc   :  { %856 = vmatpush1.bf16.msra.mxu1 %v4180_v48  ;;  %v290_v48 = vld [vmem:[%s4781_s6] sm:$0x3] }
  0xdd   :  { %857 = vmatprep.subr.bf16.mxu1 %v4188_v49  ;;  %v4704_v49 = vsub.s32 1, %v4695_v46 }
  0xe0   :  { %858 = vmatpush1.bf16.msra.mxu1 %v4186_v50  ;;  %v295_v50 = vrot.slane %v290_v48, %v4698_v47 }
  0xe1   :  { %859 = vmatprep.subr.bf16.mxu1 %v4194_v51  ;;  %v299_v51 = vrot.slane %v290_v48, %v4704_v49  ;;  %v980_v48 = vld [vmem:[#allocation12 + $0x1c8] sm:$0xff] }
  0xe4   :  { %860 = vmatpush1.bf16.msra.mxu1 %v4192_v52 }
  0xe5   :  { %861 = vmatprep.subr.bf16.mxu1 %v4200_v29  ;;  %v967_v29 = vld [vmem:[#allocation12 + $0x160] sm:$0xff] }
  0xe8   :  { %862 = vmatpush1.bf16.msra.mxu1 %v4198_v31  ;;  %v968_v31 = vld [vmem:[#allocation12 + $0x168] sm:$0xff] }
  0xe9   :  { %863 = vmatprep.subr.bf16.mxu1 %v4206_v33 }
  0xec   :  { %864 = vmatpush1.bf16.msra.mxu1 %v4204_v35 }
  0xed   :  { %2501 = vmatprep.subr.bf16.mxu1 %v3620_v41 }
 0x17a   :  { %v209_v53 = vpop.f32.mrb[0].mxu1 }
 0x17b   :  { %v4036_v54 = vpop.f32.mrb[1].mxu1 }
 0x17c   :  { %v212_v55 = vpop.f32.mrb[2].mxu1 }
 0x17d   :  { %v4037_v56 = vpop.f32.mrb[3].mxu1 }
 0x182   :  { %v258_v57 = vpop.f32.mrb[4].mxu1 }
 0x183   :  { %v259_v59 = vadd.f32 %v258_v57, %v209_v53  ;;  %v4042_v60 = vpop.f32.mrb[5].mxu1 }
 0x184   :  { %v261_v61 = vpop.f32.mrb[6].mxu1 }
 0x185   :  { %v271_v62 = vadd.f32 %v3538_v58, %v259_v59  ;;  %v4043_v63 = vpop.f32.mrb[7].mxu1  ;;  %v931_v59 = vld [vmem:[#allocation12 + $0x40] sm:$0xff] }
 0x186   :  { %v935_v61 = vld [vmem:[#allocation12 + $0x60] sm:$0xff]  ;;  %v936_v63 = vld [vmem:[#allocation12 + $0x68] sm:$0xff] }
 0x187   :  { %v272_v0 = vmax.f32 %v271_v62, 0.0  ;;  %v932_v62 = vld [vmem:[#allocation12 + $0x48] sm:$0xff] }
 0x189   :  { %v273_v2 = vpack.c.bf16 %v272_v0, %v272_v0 }
 0x18b   :  { %415 = vmatmul.mubr.bf16.vlgmr.msra.gmra.mrb[0].mxu0 %v273_v2  ;;  %v3628_v2 = vcombine.high %v931_v59, %v935_v61 }
 0x18c   :  { %875 = vmatpush1.bf16.msra.mxu0 %v4117_v1 }
 0x18d   :  { %876 = vmatprep.subr.bf16.mxu0 %v4125_v3  ;;  %v3630_v3 = vcombine.high %v932_v62, %v936_v63 }
 0x190   :  { %877 = vmatpush1.bf16.msra.mxu0 %v4123_v4  ;;  %v939_v4 = vld [vmem:[#allocation12 + $0x80] sm:$0xff] }
 0x191   :  { %878 = vmatprep.subr.bf16.mxu0 %v4131_v5  ;;  %v943_v5 = vld [vmem:[#allocation12 + $0xa0] sm:$0xff] }
 0x194   :  { %879 = vmatpush1.bf16.msra.mxu0 %v4129_v6  ;;  %v940_v6 = vld [vmem:[#allocation12 + $0x88] sm:$0xff] }
 0x195   :  { %880 = vmatprep.subr.bf16.mxu0 %v4137_v7  ;;  %v944_v7 = vld [vmem:[#allocation12 + $0xa8] sm:$0xff] }
 0x198   :  { %881 = vmatpush1.bf16.msra.mxu0 %v4135_v8  ;;  %v3627_v8 = vcombine.low %v931_v59, %v935_v61 }
 0x199   :  { %882 = vmatprep.subr.bf16.mxu0 %v4143_v9  ;;  %v3629_v9 = vcombine.low %v932_v62, %v936_v63  ;;  %v995_v63 = vld [vmem:[#allocation12 + $0x240] sm:$0xff] }
 0x19c   :  { %883 = vmatpush1.bf16.msra.mxu0 %v4141_v10  ;;  %v3636_v10 = vcombine.high %v939_v4, %v943_v5 }
 0x19d   :  { %884 = vmatprep.subr.bf16.mxu0 %v4149_v11  ;;  %v3638_v11 = vcombine.high %v940_v6, %v944_v7 }
 0x1a0   :  { %885 = vmatpush1.bf16.msra.mxu0 %v4147_v12  ;;  %v947_v12 = vld [vmem:[#allocation12 + $0xc0] sm:$0xff] }
 0x1a1   :  { %886 = vmatprep.subr.bf16.mxu0 %v4155_v13  ;;  %v951_v13 = vld [vmem:[#allocation12 + $0xe0] sm:$0xff] }
 0x1a4   :  { %887 = vmatpush1.bf16.msra.mxu0 %v4153_v14  ;;  %v948_v14 = vld [vmem:[#allocation12 + $0xc8] sm:$0xff] }
 0x1a5   :  { %888 = vmatprep.subr.bf16.mxu0 %v4161_v15  ;;  %v952_v15 = vld [vmem:[#allocation12 + $0xe8] sm:$0xff] }
 0x1a8   :  { %889 = vmatpush1.bf16.msra.mxu0 %v4159_v16  ;;  %v3635_v16 = vcombine.low %v939_v4, %v943_v5 }
 0x1a9   :  { %890 = vmatprep.subr.bf16.mxu0 %v4167_v17  ;;  %v3637_v17 = vcombine.low %v940_v6, %v944_v7  ;;  %v1003_v7 = vld [vmem:[#allocation12 + $0x280] sm:$0xff] }
 0x1ac   :  { %891 = vmatpush1.bf16.msra.mxu0 %v4165_v18  ;;  %v3644_v18 = vcombine.high %v947_v12, %v951_v13 }
 0x1ad   :  { %892 = vmatprep.subr.bf16.mxu0 %v4173_v19  ;;  %v3646_v19 = vcombine.high %v948_v14, %v952_v15 }
 0x1b0   :  { %893 = vmatpush1.bf16.msra.mxu0 %v4171_v20  ;;  %v955_v20 = vld [vmem:[#allocation12 + $0x100] sm:$0xff] }
 0x1b1   :  { %894 = vmatprep.subr.bf16.mxu0 %v4179_v21  ;;  %v959_v21 = vld [vmem:[#allocation12 + $0x120] sm:$0xff] }
 0x1b4   :  { %895 = vmatpush1.bf16.msra.mxu0 %v4177_v22  ;;  %v956_v22 = vld [vmem:[#allocation12 + $0x108] sm:$0xff] }
 0x1b5   :  { %896 = vmatprep.subr.bf16.mxu0 %v4185_v23  ;;  %v960_v23 = vld [vmem:[#allocation12 + $0x128] sm:$0xff] }
 0x1b6   :  { %v3653_v33 = vcombine.low %v956_v22, %v960_v23 }
 0x1b8   :  { %897 = vmatpush1.bf16.msra.mxu0 %v4183_v24  ;;  %v3643_v24 = vcombine.low %v947_v12, %v951_v13 }
 0x1b9   :  { %898 = vmatprep.subr.bf16.mxu0 %v4191_v25  ;;  %v3645_v25 = vcombine.low %v948_v14, %v952_v15  ;;  %v1011_v15 = vld [vmem:[#allocation12 + $0x2c0] sm:$0xff] }
 0x1bc   :  { %899 = vmatpush1.bf16.msra.mxu0 %v4189_v26  ;;  %v3652_v26 = vcombine.high %v955_v20, %v959_v21 }
 0x1bd   :  { %900 = vmatprep.subr.bf16.mxu0 %v4197_v27  ;;  %v3654_v27 = vcombine.high %v956_v22, %v960_v23  ;;  %v1019_v23 = vld [vmem:[#allocation12 + $0x300] sm:$0xff] }
 0x1c0   :  { %901 = vmatpush1.bf16.msra.mxu0 %v4195_v28  ;;  %v963_v28 = vld [vmem:[#allocation12 + $0x140] sm:$0xff] }
 0x1c1   :  { %902 = vmatprep.subr.bf16.mxu0 %v4203_v30  ;;  %v964_v30 = vld [vmem:[#allocation12 + $0x148] sm:$0xff] }
 0x1c2   :  { %v3662_v35 = vcombine.high %v964_v30, %v968_v31  ;;  %v3661_v41 = vcombine.low %v964_v30, %v968_v31  ;;  %v1027_v31 = vld [vmem:[#allocation12 + $0x340] sm:$0xff] }
 0x1c4   :  { %903 = vmatpush1.bf16.msra.mxu0 %v4201_v32  ;;  %v3651_v32 = vcombine.low %v955_v20, %v959_v21 }
 0x1c5   :  { %904 = vmatprep.subr.bf16.mxu0 %v4209_v34  ;;  %v3660_v34 = vcombine.high %v963_v28, %v967_v29 }
 0x1c8   :  { %905 = vmatpush1.bf16.msra.mxu0 %v4207_v36  ;;  %v971_v36 = vld [vmem:[#allocation12 + $0x180] sm:$0xff] }
 0x1c9   :  { %2583 = vmatprep.subr.bf16.mxu0 %v3622_v44  ;;  %v3668_v42 = vcombine.high %v971_v36, %v975_v37  ;;  %v979_v44 = vld [vmem:[#allocation12 + $0x1c0] sm:$0xff] }
 0x1ca   :  { %v3675_v59 = vcombine.low %v979_v44, %v983_v45 }
 0x25e   :  { %v416_v52 = vpop.f32.mrb[0].mxu0 }
 0x25f   :  { %v417_v53 = vadd.f32 %v416_v52, %v295_v50  ;;  %v418_v54 = vpop.f32.mrb[1].mxu0  ;;  %v984_v50 = vld [vmem:[#allocation12 + $0x1e8] sm:$0xff]  ;;  %v3669_v52 = vcombine.low %v972_v38, %v976_v39 }
 0x260   :  { %v419_v55 = vadd.f32 %v418_v54, %v299_v51  ;;  %v420_v56 = vpop.f32.mrb[2].mxu0  ;;  %v3667_v51 = vcombine.low %v971_v36, %v975_v37  ;;  %v3678_v54 = vcombine.high %v980_v48, %v984_v50 }
 0x261   :  { %v423_v57 = vmax.f32 %v417_v53, 0.0  ;;  %v421_v58 = vpop.f32.mrb[3].mxu0  ;;  %v3676_v53 = vcombine.high %v979_v44, %v983_v45  ;;  %v991_v56 = vld [vmem:[#allocation12 + $0x220] sm:$0xff]  ;;  %v1040_v45 = vld [vmem:[#allocation12 + $0x3a8] sm:$0xff] }
 0x262   :  { %v424_v60 = vmax.f32 %v419_v55, 0.0  ;;  %v987_v55 = vld [vmem:[#allocation12 + $0x200] sm:$0xff]  ;;  %v992_v58 = vld [vmem:[#allocation12 + $0x228] sm:$0xff] }
 0x263   :  { %v425_v1 = vpack.c.bf16 %v423_v57, %v423_v57  ;;  %v988_v57 = vld [vmem:[#allocation12 + $0x208] sm:$0xff]  ;;  %v3684_v61 = vcombine.high %v987_v55, %v991_v56 }
 0x264   :  { %v426_v0 = vpack.c.bf16 %v424_v60, %v424_v60  ;;  %v3677_v60 = vcombine.low %v980_v48, %v984_v50  ;;  %v3686_v62 = vcombine.high %v988_v57, %v992_v58  ;;  %v3685_v4 = vcombine.low %v988_v57, %v992_v58 }
 0x266   :  { %865 = vmatprep.mubr.bf16.mxu1 %v426_v0  ;;  %906 = vmatprep.mubr.bf16.mxu0 %v426_v0  ;;  %v999_v0 = vld [vmem:[#allocation12 + $0x260] sm:$0xff] }
 0x267   :  { %866 = vmatmul.mubr.bf16.vlgmr.msra.gmra.mrb[8].mxu1 %v425_v1  ;;  %907 = vmatmul.mubr.bf16.vlgmr.msra.gmra.mrb[4].mxu0 %v425_v1  ;;  %v996_v1 = vld [vmem:[#allocation12 + $0x248] sm:$0xff]  ;;  %v3692_v5 = vcombine.high %v995_v63, %v999_v0 }
 0x268   :  { %2502 = vmatpush1.bf16.msra.mxu1 %v3619_v40  ;;  %2584 = vmatpush1.bf16.msra.mxu0 %v3621_v43  ;;  %v3659_v40 = vcombine.low %v963_v28, %v967_v29  ;;  %v3670_v43 = vcombine.high %v972_v38, %v976_v39 }
 0x269   :  { %2503 = vmatprep.subr.bf16.mxu1 %v3628_v2  ;;  %2585 = vmatprep.subr.bf16.mxu0 %v3630_v3  ;;  %v1000_v2 = vld [vmem:[#allocation12 + $0x268] sm:$0xff]  ;;  %v3683_v3 = vcombine.low %v987_v55, %v991_v56 }
 0x26a   :  { %v3694_v6 = vcombine.high %v996_v1, %v1000_v2  ;;  %v3693_v12 = vcombine.low %v996_v1, %v1000_v2  ;;  %v1048_v56 = vld [vmem:[#allocation12 + $0x3e8] sm:$0xff] }
 0x26c   :  { %2504 = vmatpush1.bf16.msra.mxu1 %v3627_v8  ;;  %2586 = vmatpush1.bf16.msra.mxu0 %v3629_v9  ;;  %v1007_v8 = vld [vmem:[#allocation12 + $0x2a0] sm:$0xff]  ;;  %v1004_v9 = vld [vmem:[#allocation12 + $0x288] sm:$0xff] }
 0x26d   :  { %2505 = vmatprep.subr.bf16.mxu1 %v3636_v10  ;;  %2587 = vmatprep.subr.bf16.mxu0 %v3638_v11  ;;  %v1008_v10 = vld [vmem:[#allocation12 + $0x2a8] sm:$0xff]  ;;  %v3691_v11 = vcombine.low %v995_v63, %v999_v0  ;;  %v3700_v13 = vcombine.high %v1003_v7, %v1007_v8 }
 0x26e   :  { %v3702_v14 = vcombine.high %v1004_v9, %v1008_v10  ;;  %v3701_v20 = vcombine.low %v1004_v9, %v1008_v10  ;;  %v1056_v0 = vld [vmem:[#allocation12 + $0x428] sm:$0xff] }
 0x270   :  { %2506 = vmatpush1.bf16.msra.mxu1 %v3635_v16  ;;  %2588 = vmatpush1.bf16.msra.mxu0 %v3637_v17  ;;  %v1015_v16 = vld [vmem:[#allocation12 + $0x2e0] sm:$0xff]  ;;  %v1012_v17 = vld [vmem:[#allocation12 + $0x2c8] sm:$0xff] }
 0x271   :  { %2507 = vmatprep.subr.bf16.mxu1 %v3644_v18  ;;  %2589 = vmatprep.subr.bf16.mxu0 %v3646_v19  ;;  %v1016_v18 = vld [vmem:[#allocation12 + $0x2e8] sm:$0xff]  ;;  %v3699_v19 = vcombine.low %v1003_v7, %v1007_v8  ;;  %v3708_v21 = vcombine.high %v1011_v15, %v1015_v16 }
 0x272   :  { %v3710_v22 = vcombine.high %v1012_v17, %v1016_v18  ;;  %v3709_v28 = vcombine.low %v1012_v17, %v1016_v18 }
 0x274   :  { %2508 = vmatpush1.bf16.msra.mxu1 %v3643_v24  ;;  %2590 = vmatpush1.bf16.msra.mxu0 %v3645_v25  ;;  %v1023_v24 = vld [vmem:[#allocation12 + $0x320] sm:$0xff]  ;;  %v1020_v25 = vld [vmem:[#allocation12 + $0x308] sm:$0xff] }
 0x275   :  { %2509 = vmatprep.subr.bf16.mxu1 %v3652_v26  ;;  %2591 = vmatprep.subr.bf16.mxu0 %v3654_v27  ;;  %v1024_v26 = vld [vmem:[#allocation12 + $0x328] sm:$0xff]  ;;  %v3707_v27 = vcombine.low %v1011_v15, %v1015_v16  ;;  %v3716_v29 = vcombine.high %v1019_v23, %v1023_v24 }
 0x276   :  { %v3718_v30 = vcombine.high %v1020_v25, %v1024_v26  ;;  %v3717_v36 = vcombine.low %v1020_v25, %v1024_v26  ;;  %v1060_v25 = vld [vmem:[#allocation12 + $0x448] sm:$0xff] }
 0x277   :  { %v1064_v26 = vld [vmem:[#allocation12 + $0x468] sm:$0xff] }
 0x278   :  { %2510 = vmatpush1.bf16.msra.mxu1 %v3651_v32  ;;  %2592 = vmatpush1.bf16.msra.mxu0 %v3653_v33  ;;  %v1031_v32 = vld [vmem:[#allocation12 + $0x360] sm:$0xff]  ;;  %v1028_v33 = vld [vmem:[#allocation12 + $0x348] sm:$0xff] }
 0x279   :  { %2511 = vmatprep.subr.bf16.mxu1 %v3660_v34  ;;  %2593 = vmatprep.subr.bf16.mxu0 %v3662_v35  ;;  %v1032_v34 = vld [vmem:[#allocation12 + $0x368] sm:$0xff]  ;;  %v3715_v35 = vcombine.low %v1019_v23, %v1023_v24  ;;  %v3724_v37 = vcombine.high %v1027_v31, %v1031_v32  ;;  %v3723_v39 = vcombine.low %v1027_v31, %v1031_v32  ;;  %v1063_v24 = vld [vmem:[#allocation12 + $0x460] sm:$0xff] }
 0x27a   :  { %v3726_v38 = vcombine.high %v1028_v33, %v1032_v34  ;;  %v3758_v31 = vcombine.high %v1060_v25, %v1064_v26  ;;  %v1071_v32 = vld [vmem:[#allocation12 + $0x4a0] sm:$0xff] }
 0x27c   :  { %2512 = vmatpush1.bf16.msra.mxu1 %v3659_v40  ;;  %2594 = vmatpush1.bf16.msra.mxu0 %v3661_v41  ;;  %v3725_v40 = vcombine.low %v1028_v33, %v1032_v34  ;;  %v1035_v41 = vld [vmem:[#allocation12 + $0x380] sm:$0xff]  ;;  %v1068_v33 = vld [vmem:[#allocation12 + $0x488] sm:$0xff] }
 0x27d   :  { %2513 = vmatprep.subr.bf16.mxu1 %v3668_v42  ;;  %2595 = vmatprep.subr.bf16.mxu0 %v3670_v43  ;;  %v1039_v42 = vld [vmem:[#allocation12 + $0x3a0] sm:$0xff]  ;;  %v1036_v43 = vld [vmem:[#allocation12 + $0x388] sm:$0xff] }
 0x27e   :  { %v3732_v44 = vcombine.high %v1035_v41, %v1039_v42  ;;  %v3731_v48 = vcombine.low %v1035_v41, %v1039_v42  ;;  %v3733_v50 = vcombine.low %v1036_v43, %v1040_v45  ;;  %v1072_v34 = vld [vmem:[#allocation12 + $0x4a8] sm:$0xff]  ;;  %v1079_v41 = vld [vmem:[#allocation12 + $0x4e0] sm:$0xff] }
 0x27f   :  { %v1076_v42 = vld [vmem:[#allocation12 + $0x4c8] sm:$0xff] }
 0x280   :  { %2514 = vmatpush1.bf16.msra.mxu1 %v3667_v51  ;;  %2596 = vmatpush1.bf16.msra.mxu0 %v3669_v52  ;;  %v3734_v51 = vcombine.high %v1036_v43, %v1040_v45  ;;  %v1043_v52 = vld [vmem:[#allocation12 + $0x3c0] sm:$0xff]  ;;  %v1080_v43 = vld [vmem:[#allocation12 + $0x4e8] sm:$0xff]  ;;  %v3765_v45 = vcombine.low %v1068_v33, %v1072_v34 }
 0x281   :  { %2515 = vmatprep.subr.bf16.mxu1 %v3676_v53  ;;  %2597 = vmatprep.subr.bf16.mxu0 %v3678_v54  ;;  %v1047_v53 = vld [vmem:[#allocation12 + $0x3e0] sm:$0xff]  ;;  %v1044_v54 = vld [vmem:[#allocation12 + $0x3c8] sm:$0xff] }
 0x282   :  { %v3740_v55 = vcombine.high %v1043_v52, %v1047_v53  ;;  %v3739_v57 = vcombine.low %v1043_v52, %v1047_v53  ;;  %v3741_v58 = vcombine.low %v1044_v54, %v1048_v56  ;;  %v1087_v52 = vld [vmem:[#allocation12 + $0x520] sm:$0xff]  ;;  %v1084_v53 = vld [vmem:[#allocation12 + $0x508] sm:$0xff] }
 0x284   :  { %2516 = vmatpush1.bf16.msra.mxu1 %v3675_v59  ;;  %2598 = vmatpush1.bf16.msra.mxu0 %v3677_v60  ;;  %v3742_v59 = vcombine.high %v1044_v54, %v1048_v56  ;;  %v1051_v60 = vld [vmem:[#allocation12 + $0x400] sm:$0xff]  ;;  %v1088_v54 = vld [vmem:[#allocation12 + $0x528] sm:$0xff]  ;;  %v3773_v56 = vcombine.low %v1076_v42, %v1080_v43 }
 0x285   :  { %2517 = vmatprep.subr.bf16.mxu1 %v3684_v61  ;;  %2599 = vmatprep.subr.bf16.mxu0 %v3686_v62  ;;  %v1055_v61 = vld [vmem:[#allocation12 + $0x420] sm:$0xff]  ;;  %v1052_v62 = vld [vmem:[#allocation12 + $0x408] sm:$0xff] }
 0x286   :  { %v3748_v63 = vcombine.high %v1051_v60, %v1055_v61  ;;  %v3747_v1 = vcombine.low %v1051_v60, %v1055_v61  ;;  %v3749_v2 = vcombine.low %v1052_v62, %v1056_v0  ;;  %v1095_v60 = vld [vmem:[#allocation12 + $0x560] sm:$0xff]  ;;  %v1092_v61 = vld [vmem:[#allocation12 + $0x548] sm:$0xff] }
 0x288   :  { %2518 = vmatpush1.bf16.msra.mxu1 %v3683_v3  ;;  %2600 = vmatpush1.bf16.msra.mxu0 %v3685_v4  ;;  %v3750_v3 = vcombine.high %v1052_v62, %v1056_v0  ;;  %v4708_v4 = vld [vmem:[#allocation10] sm:$0xf]  ;;  %v1096_v62 = vld [vmem:[#allocation12 + $0x568] sm:$0xff]  ;;  %v3781_v0 = vcombine.low %v1084_v53, %v1088_v54 }
 0x289   :  { %2519 = vmatprep.subr.bf16.mxu1 %v3692_v5  ;;  %2601 = vmatprep.subr.bf16.mxu0 %v3694_v6  ;;  %v507_v5 = vsub.s32 3, %v4695_v46  ;;  %v496_v6 = vrot.slane %v4708_v4, %v4698_v47  ;;  %v500_v7 = vrot.slane %v4708_v4, %v4704_v49 }
 0x28b   :  { %v508_v8 = vrot.slane %v4708_v4, %v507_v5 }
 0x28c   :  { %2520 = vmatpush1.bf16.msra.mxu1 %v3691_v11  ;;  %2602 = vmatpush1.bf16.msra.mxu0 %v3693_v12 }
 0x28d   :  { %2521 = vmatprep.subr.bf16.mxu1 %v3700_v13  ;;  %2603 = vmatprep.subr.bf16.mxu0 %v3702_v14 }
 0x290   :  { %2522 = vmatpush1.bf16.msra.mxu1 %v3699_v19  ;;  %2604 = vmatpush1.bf16.msra.mxu0 %v3701_v20 }
 0x291   :  { %2523 = vmatprep.subr.bf16.mxu1 %v3708_v21  ;;  %2605 = vmatprep.subr.bf16.mxu0 %v3710_v22  ;;  %v1059_v22 = vld [vmem:[#allocation12 + $0x440] sm:$0xff] }
 0x294   :  { %2524 = vmatpush1.bf16.msra.mxu1 %v3707_v27  ;;  %2606 = vmatpush1.bf16.msra.mxu0 %v3709_v28 }
 0x295   :  { %2525 = vmatprep.subr.bf16.mxu1 %v3716_v29  ;;  %2607 = vmatprep.subr.bf16.mxu0 %v3718_v30  ;;  %v1067_v29 = vld [vmem:[#allocation12 + $0x480] sm:$0xff]  ;;  %v3756_v30 = vcombine.high %v1059_v22, %v1063_v24 }
 0x298   :  { %2526 = vmatpush1.bf16.msra.mxu1 %v3715_v35  ;;  %2608 = vmatpush1.bf16.msra.mxu0 %v3717_v36  ;;  %v3755_v36 = vcombine.low %v1059_v22, %v1063_v24  ;;  %v1115_v22 = vld [vmem:[#allocation12 + $0x600] sm:$0xff]  ;;  %v1116_v24 = vld [vmem:[#allocation12 + $0x608] sm:$0xff] }
 0x299   :  { %2527 = vmatprep.subr.bf16.mxu1 %v3724_v37  ;;  %2609 = vmatprep.subr.bf16.mxu0 %v3726_v38  ;;  %v3757_v37 = vcombine.low %v1060_v25, %v1064_v26  ;;  %v3764_v38 = vcombine.high %v1067_v29, %v1071_v32  ;;  %v1120_v25 = vld [vmem:[#allocation12 + $0x628] sm:$0xff] }
 0x29c   :  { %2528 = vmatpush1.bf16.msra.mxu1 %v3723_v39  ;;  %2610 = vmatpush1.bf16.msra.mxu0 %v3725_v40  ;;  %v3766_v39 = vcombine.high %v1068_v33, %v1072_v34  ;;  %v1075_v40 = vld [vmem:[#allocation12 + $0x4c0] sm:$0xff]  ;;  %v1124_v34 = vld [vmem:[#allocation12 + $0x648] sm:$0xff] }
 0x29d   :  { %2529 = vmatprep.subr.bf16.mxu1 %v3732_v44  ;;  %2611 = vmatprep.subr.bf16.mxu0 %v3734_v51  ;;  %v3763_v44 = vcombine.low %v1067_v29, %v1071_v32  ;;  %v1083_v51 = vld [vmem:[#allocation12 + $0x500] sm:$0xff] }
 0x29e   :  { %v1123_v32 = vld [vmem:[#allocation12 + $0x640] sm:$0xff] }
 0x29f   :  { %v1127_v33 = vld [vmem:[#allocation12 + $0x660] sm:$0xff] }
 0x2a0   :  { %2530 = vmatpush1.bf16.msra.mxu1 %v3731_v48  ;;  %2612 = vmatpush1.bf16.msra.mxu0 %v3733_v50  ;;  %v3772_v48 = vcombine.high %v1075_v40, %v1079_v41  ;;  %v3774_v50 = vcombine.high %v1076_v42, %v1080_v43  ;;  %v1135_v42 = vld [vmem:[#allocation12 + $0x6a0] sm:$0xff]  ;;  %v1132_v43 = vld [vmem:[#allocation12 + $0x688] sm:$0xff] }
 0x2a1   :  { %2531 = vmatprep.subr.bf16.mxu1 %v3740_v55  ;;  %2613 = vmatprep.subr.bf16.mxu0 %v3742_v59  ;;  %v3771_v55 = vcombine.low %v1075_v40, %v1079_v41  ;;  %v1091_v59 = vld [vmem:[#allocation12 + $0x540] sm:$0xff] }
 0x2a2   :  { %v1131_v41 = vld [vmem:[#allocation12 + $0x680] sm:$0xff] }
 0x2a4   :  { %2532 = vmatpush1.bf16.msra.mxu1 %v3739_v57  ;;  %2614 = vmatpush1.bf16.msra.mxu0 %v3741_v58  ;;  %v3780_v57 = vcombine.high %v1083_v51, %v1087_v52  ;;  %v3782_v58 = vcombine.high %v1084_v53, %v1088_v54  ;;  %v1143_v53 = vld [vmem:[#allocation12 + $0x6e0] sm:$0xff]  ;;  %v1140_v54 = vld [vmem:[#allocation12 + $0x6c8] sm:$0xff] }
 0x2a5   :  { %2542 = vmatprep.subr.bf16.mxu1 %v3748_v63  ;;  %2624 = vmatprep.subr.bf16.mxu0 %v3750_v3  ;;  %v3779_v63 = vcombine.low %v1083_v51, %v1087_v52  ;;  %v1099_v3 = vld [vmem:[#allocation12 + $0x580] sm:$0xff] }
 0x2a6   :  { %v1139_v52 = vld [vmem:[#allocation12 + $0x6c0] sm:$0xff] }
 0x33a   :  { %v867_v9 = vpop.f32.mrb[8].mxu1  ;;  %v4718_v10 = vpop.f32.mrb[4].mxu0 }
 0x33b   :  { %v868_v11 = vadd.f32 %v867_v9, %v496_v6  ;;  %v869_v12 = vpop.f32.mrb[9].mxu1  ;;  %v910_v13 = vpop.f32.mrb[5].mxu0  ;;  %v1103_v6 = vld [vmem:[#allocation12 + $0x5a0] sm:$0xff]  ;;  %v3787_v9 = vcombine.low %v1091_v59, %v1095_v60 }
 0x33c   :  { %v870_v14 = vadd.f32 %v869_v12, %v500_v7  ;;  %v911_v15 = vadd.f32 %v910_v13, %v508_v8  ;;  %v871_v16 = vpop.f32.mrb[10].mxu1  ;;  %v912_v17 = vpop.f32.mrb[6].mxu0  ;;  %v1100_v7 = vld [vmem:[#allocation12 + $0x588] sm:$0xff]  ;;  %v3796_v12 = vcombine.high %v1099_v3, %v1103_v6 }
 0x33d   :  { %v915_v18 = vmax.f32 %v868_v11, 0.0  ;;  %v872_v19 = vpop.f32.mrb[11].mxu1  ;;  %v913_v20 = vpop.f32.mrb[7].mxu0  ;;  %v1104_v8 = vld [vmem:[#allocation12 + $0x5a8] sm:$0xff]  ;;  %v3789_v11 = vcombine.low %v1092_v61, %v1096_v62 }
 0x33e   :  { %v916_v21 = vmax.f32 %v870_v14, 0.0  ;;  %v918_v23 = vmax.f32 %v911_v15, 0.0  ;;  %v3798_v13 = vcombine.high %v1100_v7, %v1104_v8  ;;  %v1107_v14 = vld [vmem:[#allocation12 + $0x5c0] sm:$0xff]  ;;  %v1108_v16 = vld [vmem:[#allocation12 + $0x5c8] sm:$0xff]  ;;  %v3797_v19 = vcombine.low %v1100_v7, %v1104_v8 }
 0x33f   :  { %v4722_v28 = vpack.c.bf16 %v915_v18, %v915_v18  ;;  %v1111_v15 = vld [vmem:[#allocation12 + $0x5e0] sm:$0xff]  ;;  %v1112_v17 = vld [vmem:[#allocation12 + $0x5e8] sm:$0xff]  ;;  %v3795_v18 = vcombine.low %v1099_v3, %v1103_v6 }
 0x340   :  { %v4720_v27 = vpack.c.bf16 %v916_v21, %v916_v21  ;;  %v4726_v35 = vpack.c.bf16 %v918_v23, %v918_v23  ;;  %v3804_v20 = vcombine.high %v1107_v14, %v1111_v15  ;;  %v3806_v21 = vcombine.high %v1108_v16, %v1112_v17  ;;  %v1119_v23 = vld [vmem:[#allocation12 + $0x620] sm:$0xff]  ;;  %v1156_v8 = vld [vmem:[#allocation12 + $0x748] sm:$0xff] }
 0x341   :  { %v3803_v26 = vcombine.low %v1107_v14, %v1111_v15  ;;  %v3805_v29 = vcombine.low %v1108_v16, %v1112_v17  ;;  %v1155_v6 = vld [vmem:[#allocation12 + $0x740] sm:$0xff] }
 0x342   :  { %2533 = vmatprep.mubr.bf16.mxu1 %v4720_v27  ;;  %2615 = vmatprep.mubr.bf16.mxu0 %v4720_v27  ;;  %v1159_v7 = vld [vmem:[#allocation12 + $0x760] sm:$0xff] }
 0x343   :  { %2534 = vmatmul.mubr.bf16.vlgmr.msra.gmra.mrb[12].mxu1 %v4722_v28  ;;  %2616 = vmatmul.mubr.bf16.vlgmr.msra.gmra.mrb[8].mxu0 %v4722_v28  ;;  %v3852_v14 = vcombine.high %v1155_v6, %v1159_v7  ;;  %v1163_v16 = vld [vmem:[#allocation12 + $0x780] sm:$0xff] }
 0x344   :  { %2543 = vmatpush1.bf16.msra.mxu1 %v3747_v1  ;;  %2625 = vmatpush1.bf16.msra.mxu0 %v3749_v2  ;;  %v3788_v1 = vcombine.high %v1091_v59, %v1095_v60  ;;  %v3790_v2 = vcombine.high %v1092_v61, %v1096_v62  ;;  %v1147_v60 = vld [vmem:[#allocation12 + $0x700] sm:$0xff]  ;;  %v1148_v62 = vld [vmem:[#allocation12 + $0x708] sm:$0xff] }
 0x345   :  { %2574 = vmatprep.mubr.bf16.mxu1 %v4726_v35  ;;  %2656 = vmatprep.mubr.bf16.mxu0 %v4726_v35  ;;  %v1151_v61 = vld [vmem:[#allocation12 + $0x720] sm:$0xff] }
 0x346   :  { %2544 = vmatprep.subr.bf16.mxu1 %v3756_v30  ;;  %2626 = vmatprep.subr.bf16.mxu0 %v3758_v31  ;;  %v3812_v30 = vcombine.high %v1115_v22, %v1119_v23  ;;  %v3814_v31 = vcombine.high %v1116_v24, %v1120_v25  ;;  %v1167_v17 = vld [vmem:[#allocation12 + $0x7a0] sm:$0xff] }
 0x348   :  { %2545 = vmatpush1.bf16.msra.mxu1 %v3755_v36  ;;  %2627 = vmatpush1.bf16.msra.mxu0 %v3757_v37  ;;  %v1128_v36 = vld [vmem:[#allocation12 + $0x668] sm:$0xff]  ;;  %v3811_v37 = vcombine.low %v1115_v22, %v1119_v23  ;;  %v3860_v23 = vcombine.high %v1163_v16, %v1167_v17 }
 0x349   :  { %2546 = vmatprep.subr.bf16.mxu1 %v3764_v38  ;;  %2628 = vmatprep.subr.bf16.mxu0 %v3766_v39  ;;  %v3813_v38 = vcombine.low %v1116_v24, %v1120_v25  ;;  %v3820_v39 = vcombine.high %v1123_v32, %v1127_v33  ;;  %v3822_v40 = vcombine.high %v1124_v34, %v1128_v36  ;;  %v1171_v25 = vld [vmem:[#allocation12 + $0x7c0] sm:$0xff] }
 0x34c   :  { %2547 = vmatpush1.bf16.msra.mxu1 %v3763_v44  ;;  %2629 = vmatpush1.bf16.msra.mxu0 %v3765_v45  ;;  %v1136_v44 = vld [vmem:[#allocation12 + $0x6a8] sm:$0xff]  ;;  %v3819_v45 = vcombine.low %v1123_v32, %v1127_v33 }
 0x34d   :  { %2548 = vmatprep.subr.bf16.mxu1 %v3772_v48  ;;  %2630 = vmatprep.subr.bf16.mxu0 %v3774_v50  ;;  %v3821_v48 = vcombine.low %v1124_v34, %v1128_v36  ;;  %v3828_v50 = vcombine.high %v1131_v41, %v1135_v42  ;;  %v3830_v51 = vcombine.high %v1132_v43, %v1136_v44 }
 0x350   :  { %2549 = vmatpush1.bf16.msra.mxu1 %v3771_v55  ;;  %2631 = vmatpush1.bf16.msra.mxu0 %v3773_v56  ;;  %v1144_v55 = vld [vmem:[#allocation12 + $0x6e8] sm:$0xff]  ;;  %v3827_v56 = vcombine.low %v1131_v41, %v1135_v42 }
 0x351   :  { %2550 = vmatprep.subr.bf16.mxu1 %v3780_v57  ;;  %2632 = vmatprep.subr.bf16.mxu0 %v3782_v58  ;;  %v3829_v57 = vcombine.low %v1132_v43, %v1136_v44  ;;  %v3836_v58 = vcombine.high %v1139_v52, %v1143_v53  ;;  %v3838_v59 = vcombine.high %v1140_v54, %v1144_v55 }
 0x354   :  { %2551 = vmatpush1.bf16.msra.mxu1 %v3779_v63  ;;  %2633 = vmatpush1.bf16.msra.mxu0 %v3781_v0  ;;  %v1152_v63 = vld [vmem:[#allocation12 + $0x728] sm:$0xff]  ;;  %v3835_v0 = vcombine.low %v1139_v52, %v1143_v53 }
 0x355   :  { %2552 = vmatprep.subr.bf16.mxu1 %v3788_v1  ;;  %2634 = vmatprep.subr.bf16.mxu0 %v3790_v2  ;;  %v3837_v1 = vcombine.low %v1140_v54, %v1144_v55  ;;  %v3844_v2 = vcombine.high %v1147_v60, %v1151_v61  ;;  %v3846_v3 = vcombine.high %v1148_v62, %v1152_v63 }
 0x358   :  { %2553 = vmatpush1.bf16.msra.mxu1 %v3787_v9  ;;  %2635 = vmatpush1.bf16.msra.mxu0 %v3789_v11  ;;  %v1160_v9 = vld [vmem:[#allocation12 + $0x768] sm:$0xff]  ;;  %v3843_v11 = vcombine.low %v1147_v60, %v1151_v61 }
 0x359   :  { %2554 = vmatprep.subr.bf16.mxu1 %v3796_v12  ;;  %2636 = vmatprep.subr.bf16.mxu0 %v3798_v13  ;;  %v3845_v12 = vcombine.low %v1148_v62, %v1152_v63  ;;  %v503_v13 = vsub.s32 2, %v4695_v46  ;;  %v3854_v15 = vcombine.high %v1156_v8, %v1160_v9 }
 0x35b   :  { %v504_v22 = vrot.slane %v4708_v4, %v503_v13  ;;  %v929_v4 = vld [vmem:[#allocation12 + $0x30] sm:$0xff] }
 0x35c   :  { %2555 = vmatpush1.bf16.msra.mxu1 %v3795_v18  ;;  %2637 = vmatpush1.bf16.msra.mxu0 %v3797_v19  ;;  %v1164_v18 = vld [vmem:[#allocation12 + $0x788] sm:$0xff] }
 0x35d   :  { %2556 = vmatprep.subr.bf16.mxu1 %v3804_v20  ;;  %2638 = vmatprep.subr.bf16.mxu0 %v3806_v21  ;;  %v1168_v19 = vld [vmem:[#allocation12 + $0x7a8] sm:$0xff]  ;;  %v3851_v20 = vcombine.low %v1155_v6, %v1159_v7  ;;  %v3853_v21 = vcombine.low %v1156_v8, %v1160_v9  ;;  %v909_v33 = vadd.f32 %v4718_v10, %v504_v22  ;;  %v934_v10 = vld [vmem:[#allocation12 + $0x58] sm:$0xff] }
 0x35e   :  { %v3862_v24 = vcombine.high %v1164_v18, %v1168_v19  ;;  %v3861_v32 = vcombine.low %v1164_v18, %v1168_v19  ;;  %v965_v19 = vld [vmem:[#allocation12 + $0x150] sm:$0xff]  ;;  %v970_v22 = vld [vmem:[#allocation12 + $0x178] sm:$0xff] }
 0x35f   :  { %v917_v42 = vmax.f32 %v909_v33, 0.0 }
 0x360   :  { %2557 = vmatpush1.bf16.msra.mxu1 %v3803_v26  ;;  %2639 = vmatpush1.bf16.msra.mxu0 %v3805_v29  ;;  %v1175_v26 = vld [vmem:[#allocation12 + $0x7e0] sm:$0xff]  ;;  %v1172_v29 = vld [vmem:[#allocation12 + $0x7c8] sm:$0xff] }
 0x361   :  { %2558 = vmatprep.subr.bf16.mxu1 %v3812_v30  ;;  %2640 = vmatprep.subr.bf16.mxu0 %v3814_v31  ;;  %v1176_v30 = vld [vmem:[#allocation12 + $0x7e8] sm:$0xff]  ;;  %v3859_v31 = vcombine.low %v1163_v16, %v1167_v17  ;;  %v3868_v34 = vcombine.high %v1171_v25, %v1175_v26  ;;  %v4737_v52 = vpack.c.bf16 %v917_v42, %v917_v42 }
 0x362   :  { %v3870_v36 = vcombine.high %v1172_v29, %v1176_v30  ;;  %v3869_v41 = vcombine.low %v1172_v29, %v1176_v30  ;;  %v973_v29 = vld [vmem:[#allocation12 + $0x190] sm:$0xff] }
 0x363   :  { %v977_v30 = vld [vmem:[#allocation12 + $0x1b0] sm:$0xff] }
 0x364   :  { %2559 = vmatpush1.bf16.msra.mxu1 %v3811_v37  ;;  %2641 = vmatpush1.bf16.msra.mxu0 %v3813_v38  ;;  %v925_v37 = vld [vmem:[#allocation12 + $0x10] sm:$0xff]  ;;  %v926_v38 = vld [vmem:[#allocation12 + $0x18] sm:$0xff] }
 0x365   :  { %2560 = vmatprep.subr.bf16.mxu1 %v3820_v39  ;;  %2642 = vmatprep.subr.bf16.mxu0 %v3822_v40  ;;  %v930_v39 = vld [vmem:[#allocation12 + $0x38] sm:$0xff]  ;;  %v3867_v40 = vcombine.low %v1171_v25, %v1175_v26  ;;  %v3624_v43 = vcombine.high %v925_v37, %v929_v4 }
 0x366   :  { %v3626_v44 = vcombine.high %v926_v38, %v930_v39  ;;  %v3625_v53 = vcombine.low %v926_v38, %v930_v39  ;;  %v985_v38 = vld [vmem:[#allocation12 + $0x1f0] sm:$0xff]  ;;  %v982_v39 = vld [vmem:[#allocation12 + $0x1d8] sm:$0xff] }
 0x368   :  { %2561 = vmatpush1.bf16.msra.mxu1 %v3819_v45  ;;  %2643 = vmatpush1.bf16.msra.mxu0 %v3821_v48  ;;  %v933_v45 = vld [vmem:[#allocation12 + $0x50] sm:$0xff] }
 0x369   :  { %2562 = vmatprep.subr.bf16.mxu1 %v3828_v50  ;;  %2644 = vmatprep.subr.bf16.mxu0 %v3830_v51  ;;  %v937_v48 = vld [vmem:[#allocation12 + $0x70] sm:$0xff]  ;;  %v938_v50 = vld [vmem:[#allocation12 + $0x78] sm:$0xff]  ;;  %v3623_v51 = vcombine.low %v925_v37, %v929_v4 }
 0x36a   :  { %v3632_v54 = vcombine.high %v933_v45, %v937_v48  ;;  %v3634_v55 = vcombine.high %v934_v10, %v938_v50  ;;  %v3631_v60 = vcombine.low %v933_v45, %v937_v48  ;;  %v3633_v61 = vcombine.low %v934_v10, %v938_v50  ;;  %v981_v4 = vld [vmem:[#allocation12 + $0x1d0] sm:$0xff]  ;;  %v990_v10 = vld [vmem:[#allocation12 + $0x218] sm:$0xff] }
 0x36b   :  { %v989_v45 = vld [vmem:[#allocation12 + $0x210] sm:$0xff]  ;;  %v994_v50 = vld [vmem:[#allocation12 + $0x238] sm:$0xff] }
 0x36c   :  { %2563 = vmatpush1.bf16.msra.mxu1 %v3827_v56  ;;  %2645 = vmatpush1.bf16.msra.mxu0 %v3829_v57  ;;  %v941_v56 = vld [vmem:[#allocation12 + $0x90] sm:$0xff] }
 0x36d   :  { %2564 = vmatprep.subr.bf16.mxu1 %v3836_v58  ;;  %2646 = vmatprep.subr.bf16.mxu0 %v3838_v59  ;;  %v945_v57 = vld [vmem:[#allocation12 + $0xb0] sm:$0xff]  ;;  %v942_v58 = vld [vmem:[#allocation12 + $0x98] sm:$0xff] }
 0x36e   :  { %v946_v59 = vld [vmem:[#allocation12 + $0xb8] sm:$0xff]  ;;  %v3640_v62 = vcombine.high %v941_v56, %v945_v57  ;;  %v3639_v6 = vcombine.low %v941_v56, %v945_v57  ;;  %v993_v48 = vld [vmem:[#allocation12 + $0x230] sm:$0xff] }
 0x36f   :  { %v3642_v63 = vcombine.high %v942_v58, %v946_v59  ;;  %v3641_v7 = vcombine.low %v942_v58, %v946_v59  ;;  %v997_v56 = vld [vmem:[#allocation12 + $0x250] sm:$0xff]  ;;  %v998_v58 = vld [vmem:[#allocation12 + $0x258] sm:$0xff] }
 0x370   :  { %2565 = vmatpush1.bf16.msra.mxu1 %v3835_v0  ;;  %2647 = vmatpush1.bf16.msra.mxu0 %v3837_v1  ;;  %v949_v0 = vld [vmem:[#allocation12 + $0xd0] sm:$0xff]  ;;  %v1002_v59 = vld [vmem:[#allocation12 + $0x278] sm:$0xff] }
 0x371   :  { %2566 = vmatprep.subr.bf16.mxu1 %v3844_v2  ;;  %2648 = vmatprep.subr.bf16.mxu0 %v3846_v3  ;;  %v953_v1 = vld [vmem:[#allocation12 + $0xf0] sm:$0xff]  ;;  %v950_v2 = vld [vmem:[#allocation12 + $0xd8] sm:$0xff] }
 0x372   :  { %v954_v3 = vld [vmem:[#allocation12 + $0xf8] sm:$0xff]  ;;  %v3648_v8 = vcombine.high %v949_v0, %v953_v1  ;;  %v1001_v57 = vld [vmem:[#allocation12 + $0x270] sm:$0xff] }
 0x373   :  { %v3650_v9 = vcombine.high %v950_v2, %v954_v3  ;;  %v3649_v16 = vcombine.low %v950_v2, %v954_v3  ;;  %v1006_v2 = vld [vmem:[#allocation12 + $0x298] sm:$0xff] }
 0x374   :  { %2567 = vmatpush1.bf16.msra.mxu1 %v3843_v11  ;;  %2649 = vmatpush1.bf16.msra.mxu0 %v3845_v12  ;;  %v957_v11 = vld [vmem:[#allocation12 + $0x110] sm:$0xff]  ;;  %v1010_v3 = vld [vmem:[#allocation12 + $0x2b8] sm:$0xff] }
 0x375   :  { %2568 = vmatprep.subr.bf16.mxu1 %v3852_v14  ;;  %2650 = vmatprep.subr.bf16.mxu0 %v3854_v15  ;;  %v961_v12 = vld [vmem:[#allocation12 + $0x130] sm:$0xff]  ;;  %v962_v14 = vld [vmem:[#allocation12 + $0x138] sm:$0xff]  ;;  %v3647_v15 = vcombine.low %v949_v0, %v953_v1 }
 0x376   :  { %v3656_v17 = vcombine.high %v957_v11, %v961_v12  ;;  %v1005_v0 = vld [vmem:[#allocation12 + $0x290] sm:$0xff] }
 0x377   :  { %v1009_v1 = vld [vmem:[#allocation12 + $0x2b0] sm:$0xff] }
 0x378   :  { %2569 = vmatpush1.bf16.msra.mxu1 %v3851_v20  ;;  %2651 = vmatpush1.bf16.msra.mxu0 %v3853_v21  ;;  %v969_v20 = vld [vmem:[#allocation12 + $0x170] sm:$0xff]  ;;  %v966_v21 = vld [vmem:[#allocation12 + $0x158] sm:$0xff] }
 0x379   :  { %2570 = vmatprep.subr.bf16.mxu1 %v3860_v23  ;;  %2652 = vmatprep.subr.bf16.mxu0 %v3862_v24  ;;  %v3655_v23 = vcombine.low %v957_v11, %v961_v12  ;;  %v3664_v25 = vcombine.high %v965_v19, %v969_v20  ;;  %v3666_v26 = vcombine.high %v966_v21, %v970_v22  ;;  %v1013_v11 = vld [vmem:[#allocation12 + $0x2d0] sm:$0xff] }
 0x37a   :  { %v3663_v33 = vcombine.low %v965_v19, %v969_v20  ;;  %v1017_v12 = vld [vmem:[#allocation12 + $0x2f0] sm:$0xff] }
 0x37b   :  { %v1021_v19 = vld [vmem:[#allocation12 + $0x310] sm:$0xff] }
 0x37c   :  { %2571 = vmatpush1.bf16.msra.mxu1 %v3859_v31  ;;  %2653 = vmatpush1.bf16.msra.mxu0 %v3861_v32  ;;  %v974_v31 = vld [vmem:[#allocation12 + $0x198] sm:$0xff]  ;;  %v1025_v20 = vld [vmem:[#allocation12 + $0x330] sm:$0xff] }
 0x37d   :  { %2572 = vmatprep.subr.bf16.mxu1 %v3868_v34  ;;  %2654 = vmatprep.subr.bf16.mxu0 %v3870_v36  ;;  %v978_v32 = vld [vmem:[#allocation12 + $0x1b8] sm:$0xff]  ;;  %v3665_v34 = vcombine.low %v966_v21, %v970_v22  ;;  %v3672_v36 = vcombine.high %v973_v29, %v977_v30 }
 0x37e   :  { %v3674_v37 = vcombine.high %v974_v31, %v978_v32  ;;  %v3673_v42 = vcombine.low %v974_v31, %v978_v32  ;;  %v1022_v21 = vld [vmem:[#allocation12 + $0x318] sm:$0xff] }
 0x37f   :  { %v1026_v22 = vld [vmem:[#allocation12 + $0x338] sm:$0xff] }
 0x380   :  { %2573 = vmatpush1.bf16.msra.mxu1 %v3867_v40  ;;  %2655 = vmatpush1.bf16.msra.mxu0 %v3869_v41  ;;  %v986_v40 = vld [vmem:[#allocation12 + $0x1f8] sm:$0xff]  ;;  %v3671_v41 = vcombine.low %v973_v29, %v977_v30  ;;  %v1029_v29 = vld [vmem:[#allocation12 + $0x350] sm:$0xff] }
 0x381   :  { %2665 = vmatprep.subr.bf16.mxu1 %v3624_v43  ;;  %2747 = vmatprep.subr.bf16.mxu0 %v3626_v44  ;;  %v3680_v43 = vcombine.high %v981_v4, %v985_v38  ;;  %v3682_v44 = vcombine.high %v982_v39, %v986_v40  ;;  %v1033_v30 = vld [vmem:[#allocation12 + $0x370] sm:$0xff]  ;;  %v1030_v31 = vld [vmem:[#allocation12 + $0x358] sm:$0xff] }
 0x382   :  { %v1034_v32 = vld [vmem:[#allocation12 + $0x378] sm:$0xff] }
 0x383   :  { %2575 = vmatmul.mubr.bf16.vlgmr.msra.gmra.mrb[12].mxu1 %v4737_v52  ;;  %2657 = vmatmul.mubr.bf16.vlgmr.msra.gmra.mrb[8].mxu0 %v4737_v52 }
 0x384   :  { %2666 = vmatpush1.bf16.msra.mxu1 %v3623_v51  ;;  %2697 = vmatprep.mubr.bf16.mxu1 %v4720_v27  ;;  %v3679_v51 = vcombine.low %v981_v4, %v985_v38  ;;  %v1037_v4 = vld [vmem:[#allocation12 + $0x390] sm:$0xff] }
 0x385   :  { %2748 = vmatpush1.bf16.msra.mxu0 %v3625_v53  ;;  %2779 = vmatprep.mubr.bf16.mxu0 %v4720_v27  ;;  %v958_v27 = vld [vmem:[#allocation12 + $0x118] sm:$0xff]  ;;  %v3681_v53 = vcombine.low %v982_v39, %v986_v40  ;;  %v1041_v38 = vld [vmem:[#allocation12 + $0x3b0] sm:$0xff] }
 0x386   :  { %2667 = vmatprep.subr.bf16.mxu1 %v3632_v54  ;;  %2749 = vmatprep.subr.bf16.mxu0 %v3634_v55  ;;  %v3658_v18 = vcombine.high %v958_v27, %v962_v14  ;;  %v3657_v24 = vcombine.low %v958_v27, %v962_v14  ;;  %v3688_v54 = vcombine.high %v989_v45, %v993_v48  ;;  %v1014_v27 = vld [vmem:[#allocation12 + $0x2d8] sm:$0xff] }
 0x387   :  { %v3690_v55 = vcombine.high %v990_v10, %v994_v50  ;;  %v1018_v14 = vld [vmem:[#allocation12 + $0x2f8] sm:$0xff] }
 0x388   :  { %2668 = vmatpush1.bf16.msra.mxu1 %v3631_v60  ;;  %v3687_v60 = vcombine.low %v989_v45, %v993_v48  ;;  %v1038_v39 = vld [vmem:[#allocation12 + $0x398] sm:$0xff]  ;;  %v1045_v45 = vld [vmem:[#allocation12 + $0x3d0] sm:$0xff] }
 0x389   :  { %2750 = vmatpush1.bf16.msra.mxu0 %v3633_v61  ;;  %2669 = vmatprep.subr.bf16.mxu1 %v3640_v62  ;;  %v3689_v61 = vcombine.low %v990_v10, %v994_v50  ;;  %v3696_v62 = vcombine.high %v997_v56, %v1001_v57  ;;  %v1042_v40 = vld [vmem:[#allocation12 + $0x3b8] sm:$0xff]  ;;  %v1049_v48 = vld [vmem:[#allocation12 + $0x3f0] sm:$0xff] }
 0x38a   :  { %2751 = vmatprep.subr.bf16.mxu0 %v3642_v63  ;;  %v3698_v63 = vcombine.high %v998_v58, %v1002_v59  ;;  %v1046_v10 = vld [vmem:[#allocation12 + $0x3d8] sm:$0xff] }
 0x38b   :  { %v1050_v50 = vld [vmem:[#allocation12 + $0x3f8] sm:$0xff] }
 0x38c   :  { %2670 = vmatpush1.bf16.msra.mxu1 %v3639_v6  ;;  %v3695_v6 = vcombine.low %v997_v56, %v1001_v57  ;;  %v1053_v56 = vld [vmem:[#allocation12 + $0x410] sm:$0xff] }
 0x38d   :  { %2752 = vmatpush1.bf16.msra.mxu0 %v3641_v7  ;;  %2671 = vmatprep.subr.bf16.mxu1 %v3648_v8  ;;  %v3697_v7 = vcombine.low %v998_v58, %v1002_v59  ;;  %v3704_v8 = vcombine.high %v1005_v0, %v1009_v1  ;;  %v1057_v57 = vld [vmem:[#allocation12 + $0x430] sm:$0xff]  ;;  %v1054_v58 = vld [vmem:[#allocation12 + $0x418] sm:$0xff] }
 0x38e   :  { %2753 = vmatprep.subr.bf16.mxu0 %v3650_v9  ;;  %v3706_v9 = vcombine.high %v1006_v2, %v1010_v3  ;;  %v1058_v59 = vld [vmem:[#allocation12 + $0x438] sm:$0xff] }
 0x390   :  { %2672 = vmatpush1.bf16.msra.mxu1 %v3647_v15  ;;  %v3703_v15 = vcombine.low %v1005_v0, %v1009_v1  ;;  %v1061_v0 = vld [vmem:[#allocation12 + $0x450] sm:$0xff] }
 0x391   :  { %2754 = vmatpush1.bf16.msra.mxu0 %v3649_v16  ;;  %2673 = vmatprep.subr.bf16.mxu1 %v3656_v17  ;;  %v3705_v16 = vcombine.low %v1006_v2, %v1010_v3  ;;  %v3712_v17 = vcombine.high %v1013_v11, %v1017_v12  ;;  %v1065_v1 = vld [vmem:[#allocation12 + $0x470] sm:$0xff]  ;;  %v3751_v2 = vcombine.low %v1053_v56, %v1057_v57  ;;  %v1062_v3 = vld [vmem:[#allocation12 + $0x458] sm:$0xff] }
 0x392   :  { %2755 = vmatprep.subr.bf16.mxu0 %v3658_v18  ;;  %v3714_v18 = vcombine.high %v1014_v27, %v1018_v14 }
 0x394   :  { %2674 = vmatpush1.bf16.msra.mxu1 %v3655_v23  ;;  %v3711_v23 = vcombine.low %v1013_v11, %v1017_v12  ;;  %v1073_v11 = vld [vmem:[#allocation12 + $0x4b0] sm:$0xff] }
 0x395   :  { %2756 = vmatpush1.bf16.msra.mxu0 %v3657_v24  ;;  %2675 = vmatprep.subr.bf16.mxu1 %v3664_v25  ;;  %v3713_v24 = vcombine.low %v1014_v27, %v1018_v14  ;;  %v3720_v25 = vcombine.high %v1021_v19, %v1025_v20  ;;  %v1070_v27 = vld [vmem:[#allocation12 + $0x498] sm:$0xff] }
 0x396   :  { %2757 = vmatprep.subr.bf16.mxu0 %v3666_v26  ;;  %v3722_v26 = vcombine.high %v1022_v21, %v1026_v22  ;;  %v1074_v14 = vld [vmem:[#allocation12 + $0x4b8] sm:$0xff] }
 0x398   :  { %2676 = vmatpush1.bf16.msra.mxu1 %v3663_v33  ;;  %v3719_v33 = vcombine.low %v1021_v19, %v1025_v20  ;;  %v1077_v19 = vld [vmem:[#allocation12 + $0x4d0] sm:$0xff] }
 0x399   :  { %2758 = vmatpush1.bf16.msra.mxu0 %v3665_v34  ;;  %2677 = vmatprep.subr.bf16.mxu1 %v3672_v36  ;;  %v3721_v34 = vcombine.low %v1022_v21, %v1026_v22  ;;  %v3728_v36 = vcombine.high %v1029_v29, %v1033_v30  ;;  %v1081_v20 = vld [vmem:[#allocation12 + $0x4f0] sm:$0xff]  ;;  %v1078_v21 = vld [vmem:[#allocation12 + $0x4d8] sm:$0xff] }
 0x39a   :  { %2759 = vmatprep.subr.bf16.mxu0 %v3674_v37  ;;  %v3730_v37 = vcombine.high %v1030_v31, %v1034_v32  ;;  %v1082_v22 = vld [vmem:[#allocation12 + $0x4f8] sm:$0xff] }
 0x39c   :  { %2678 = vmatpush1.bf16.msra.mxu1 %v3671_v41  ;;  %v3727_v41 = vcombine.low %v1029_v29, %v1033_v30  ;;  %v1089_v29 = vld [vmem:[#allocation12 + $0x530] sm:$0xff]  ;;  %v1086_v30 = vld [vmem:[#allocation12 + $0x518] sm:$0xff] }
 0x39d   :  { %2760 = vmatpush1.bf16.msra.mxu0 %v3673_v42  ;;  %2679 = vmatprep.subr.bf16.mxu1 %v3680_v43  ;;  %v3729_v42 = vcombine.low %v1030_v31, %v1034_v32  ;;  %v3736_v43 = vcombine.high %v1037_v4, %v1041_v38  ;;  %v1090_v31 = vld [vmem:[#allocation12 + $0x538] sm:$0xff]  ;;  %v3777_v32 = vcombine.low %v1078_v21, %v1082_v22 }
 0x39e   :  { %2761 = vmatprep.subr.bf16.mxu0 %v3682_v44  ;;  %v3738_v44 = vcombine.high %v1038_v39, %v1042_v40 }
 0x3a0   :  { %2680 = vmatpush1.bf16.msra.mxu1 %v3679_v51  ;;  %v3735_v51 = vcombine.low %v1037_v4, %v1041_v38  ;;  %v1094_v4 = vld [vmem:[#allocation12 + $0x558] sm:$0xff] }
 0x3a1   :  { %2762 = vmatpush1.bf16.msra.mxu0 %v3681_v53  ;;  %2681 = vmatprep.subr.bf16.mxu1 %v3688_v54  ;;  %v3737_v53 = vcombine.low %v1038_v39, %v1042_v40  ;;  %v3744_v54 = vcombine.high %v1045_v45, %v1049_v48  ;;  %v1098_v38 = vld [vmem:[#allocation12 + $0x578] sm:$0xff]  ;;  %v3785_v40 = vcombine.low %v1086_v30, %v1090_v31 }
 0x3a2   :  { %2763 = vmatprep.subr.bf16.mxu0 %v3690_v55  ;;  %v3746_v55 = vcombine.high %v1046_v10, %v1050_v50 }
 0x3a4   :  { %2682 = vmatpush1.bf16.msra.mxu1 %v3687_v60  ;;  %v3743_v60 = vcombine.low %v1045_v45, %v1049_v48  ;;  %v1102_v45 = vld [vmem:[#allocation12 + $0x598] sm:$0xff] }
 0x3a5   :  { %2764 = vmatpush1.bf16.msra.mxu0 %v3689_v61  ;;  %2683 = vmatprep.subr.bf16.mxu1 %v3696_v62  ;;  %v3745_v61 = vcombine.low %v1046_v10, %v1050_v50  ;;  %v3752_v62 = vcombine.high %v1053_v56, %v1057_v57  ;;  %v1106_v48 = vld [vmem:[#allocation12 + $0x5b8] sm:$0xff]  ;;  %v3793_v50 = vcombine.low %v1094_v4, %v1098_v38 }
 0x3a6   :  { %2765 = vmatprep.subr.bf16.mxu0 %v3698_v63  ;;  %v3754_v63 = vcombine.high %v1054_v58, %v1058_v59  ;;  %v1110_v56 = vld [vmem:[#allocation12 + $0x5d8] sm:$0xff] }
 0x3a7   :  { %v1114_v57 = vld [vmem:[#allocation12 + $0x5f8] sm:$0xff] }
 0x3a8   :  { %2684 = vmatpush1.bf16.msra.mxu1 %v3695_v6  ;;  %v1066_v6 = vld [vmem:[#allocation12 + $0x478] sm:$0xff] }
 0x3a9   :  { %2766 = vmatpush1.bf16.msra.mxu0 %v3697_v7  ;;  %2685 = vmatprep.subr.bf16.mxu1 %v3704_v8  ;;  %v3753_v7 = vcombine.low %v1054_v58, %v1058_v59  ;;  %v3760_v8 = vcombine.high %v1061_v0, %v1065_v1  ;;  %v3762_v12 = vcombine.high %v1062_v3, %v1066_v6 }
 0x3aa   :  { %2767 = vmatprep.subr.bf16.mxu0 %v3706_v9  ;;  %v1069_v9 = vld [vmem:[#allocation12 + $0x490] sm:$0xff]  ;;  %v3801_v59 = vcombine.low %v1102_v45, %v1106_v48 }
 0x3ac   :  { %2686 = vmatpush1.bf16.msra.mxu1 %v3703_v15  ;;  %v3759_v15 = vcombine.low %v1061_v0, %v1065_v1  ;;  %v1118_v0 = vld [vmem:[#allocation12 + $0x618] sm:$0xff] }
 0x3ad   :  { %2768 = vmatpush1.bf16.msra.mxu0 %v3705_v16  ;;  %2687 = vmatprep.subr.bf16.mxu1 %v3712_v17  ;;  %v3761_v16 = vcombine.low %v1062_v3, %v1066_v6  ;;  %v3768_v17 = vcombine.high %v1069_v9, %v1073_v11  ;;  %v1122_v1 = vld [vmem:[#allocation12 + $0x638] sm:$0xff]  ;;  %v3809_v3 = vcombine.low %v1110_v56, %v1114_v57 }
 0x3ae   :  { %2769 = vmatprep.subr.bf16.mxu0 %v3714_v18  ;;  %v3770_v18 = vcombine.high %v1070_v27, %v1074_v14 }
 0x3b0   :  { %2688 = vmatpush1.bf16.msra.mxu1 %v3711_v23  ;;  %v3767_v23 = vcombine.low %v1069_v9, %v1073_v11  ;;  %v1129_v9 = vld [vmem:[#allocation12 + $0x670] sm:$0xff]  ;;  %v1126_v11 = vld [vmem:[#allocation12 + $0x658] sm:$0xff] }
 0x3b1   :  { %2770 = vmatpush1.bf16.msra.mxu0 %v3713_v24  ;;  %2689 = vmatprep.subr.bf16.mxu1 %v3720_v25  ;;  %v3776_v24 = vcombine.high %v1077_v19, %v1081_v20  ;;  %v3778_v25 = vcombine.high %v1078_v21, %v1082_v22 }
 0x3b2   :  { %2771 = vmatprep.subr.bf16.mxu0 %v3722_v26  ;;  %v1085_v26 = vld [vmem:[#allocation12 + $0x510] sm:$0xff] }
 0x3b3   :  { %v3783_v39 = vcombine.low %v1085_v26, %v1089_v29 }
 0x3b4   :  { %2690 = vmatpush1.bf16.msra.mxu1 %v3719_v33  ;;  %v3784_v33 = vcombine.high %v1085_v26, %v1089_v29  ;;  %v1142_v26 = vld [vmem:[#allocation12 + $0x6d8] sm:$0xff] }
 0x3b5   :  { %2772 = vmatpush1.bf16.msra.mxu0 %v3721_v34  ;;  %2691 = vmatprep.subr.bf16.mxu1 %v3728_v36  ;;  %v3786_v34 = vcombine.high %v1086_v30, %v1090_v31  ;;  %v1093_v36 = vld [vmem:[#allocation12 + $0x550] sm:$0xff]  ;;  %v1146_v29 = vld [vmem:[#allocation12 + $0x6f8] sm:$0xff] }
 0x3b6   :  { %2773 = vmatprep.subr.bf16.mxu0 %v3730_v37  ;;  %v1097_v37 = vld [vmem:[#allocation12 + $0x570] sm:$0xff] }
 0x3b7   :  { %v3791_v10 = vcombine.low %v1093_v36, %v1097_v37 }
 0x3b8   :  { %2692 = vmatpush1.bf16.msra.mxu1 %v3727_v41  ;;  %v3792_v41 = vcombine.high %v1093_v36, %v1097_v37  ;;  %v1150_v36 = vld [vmem:[#allocation12 + $0x718] sm:$0xff] }
 0x3b9   :  { %2774 = vmatpush1.bf16.msra.mxu0 %v3729_v42  ;;  %2693 = vmatprep.subr.bf16.mxu1 %v3736_v43  ;;  %v3794_v42 = vcombine.high %v1094_v4, %v1098_v38  ;;  %v1101_v43 = vld [vmem:[#allocation12 + $0x590] sm:$0xff]  ;;  %v1154_v37 = vld [vmem:[#allocation12 + $0x738] sm:$0xff]  ;;  %v3841_v38 = vcombine.low %v1142_v26, %v1146_v29 }
 0x3ba   :  { %2775 = vmatprep.subr.bf16.mxu0 %v3738_v44  ;;  %v1105_v44 = vld [vmem:[#allocation12 + $0x5b0] sm:$0xff] }
 0x3bb   :  { %v3799_v58 = vcombine.low %v1101_v43, %v1105_v44 }
 0x3bc   :  { %2694 = vmatpush1.bf16.msra.mxu1 %v3735_v51  ;;  %v3800_v51 = vcombine.high %v1101_v43, %v1105_v44  ;;  %v1158_v43 = vld [vmem:[#allocation12 + $0x758] sm:$0xff] }
 0x3bd   :  { %2776 = vmatpush1.bf16.msra.mxu0 %v3737_v53  ;;  %2695 = vmatprep.subr.bf16.mxu1 %v3744_v54  ;;  %v3802_v53 = vcombine.high %v1102_v45, %v1106_v48  ;;  %v1109_v54 = vld [vmem:[#allocation12 + $0x5d0] sm:$0xff]  ;;  %v1162_v44 = vld [vmem:[#allocation12 + $0x778] sm:$0xff]  ;;  %v3849_v48 = vcombine.low %v1150_v36, %v1154_v37 }
 0x3be   :  { %2777 = vmatprep.subr.bf16.mxu0 %v3746_v55  ;;  %v1113_v55 = vld [vmem:[#allocation12 + $0x5f0] sm:$0xff] }
 0x3c0   :  { %2696 = vmatpush1.bf16.msra.mxu1 %v3743_v60  ;;  %v3808_v60 = vcombine.high %v1109_v54, %v1113_v55 }
 0x3c1   :  { %2778 = vmatpush1.bf16.msra.mxu0 %v3745_v61  ;;  %2706 = vmatprep.subr.bf16.mxu1 %v3752_v62  ;;  %v3810_v61 = vcombine.high %v1110_v56, %v1114_v57  ;;  %v1117_v62 = vld [vmem:[#allocation12 + $0x610] sm:$0xff]  ;;  %v3857_v57 = vcombine.low %v1158_v43, %v1162_v44 }
 0x3c2   :  { %2788 = vmatprep.subr.bf16.mxu0 %v3754_v63  ;;  %v1121_v63 = vld [vmem:[#allocation12 + $0x630] sm:$0xff] }
 0x3c3   :  { %2698 = vmatmul.mubr.bf16.vlgmr.msra.gmra.mrb[16].mxu1 %v4722_v28  ;;  %v3816_v6 = vcombine.high %v1117_v62, %v1121_v63 }
 0x3c4   :  { %2780 = vmatmul.mubr.bf16.vlgmr.msra.gmra.mrb[12].mxu0 %v4722_v28  ;;  %2707 = vmatpush1.bf16.msra.mxu1 %v3751_v2  ;;  %v3769_v28 = vcombine.low %v1070_v27, %v1074_v14  ;;  %v3807_v2 = vcombine.low %v1109_v54, %v1113_v55  ;;  %v3815_v27 = vcombine.low %v1117_v62, %v1121_v63  ;;  %v1166_v54 = vld [vmem:[#allocation12 + $0x798] sm:$0xff] }
 0x3c5   :  { %2738 = vmatprep.mubr.bf16.mxu1 %v4726_v35  ;;  %2789 = vmatpush1.bf16.msra.mxu0 %v3753_v7  ;;  %v3818_v7 = vcombine.high %v1118_v0, %v1122_v1  ;;  %v3817_v14 = vcombine.low %v1118_v0, %v1122_v1  ;;  %v1170_v55 = vld [vmem:[#allocation12 + $0x7b8] sm:$0xff] }
 0x3c6   :  { %2820 = vmatprep.mubr.bf16.mxu0 %v4726_v35  ;;  %2708 = vmatprep.subr.bf16.mxu1 %v3760_v8  ;;  %v3775_v35 = vcombine.low %v1077_v19, %v1081_v20  ;;  %v1125_v8 = vld [vmem:[#allocation12 + $0x650] sm:$0xff]  ;;  %v1134_v19 = vld [vmem:[#allocation12 + $0x698] sm:$0xff]  ;;  %v3865_v1 = vcombine.low %v1166_v54, %v1170_v55 }
 0x3c7   :  { %2790 = vmatprep.subr.bf16.mxu0 %v3762_v12  ;;  %v1130_v12 = vld [vmem:[#allocation12 + $0x678] sm:$0xff]  ;;  %v3823_v21 = vcombine.low %v1125_v8, %v1129_v9 }
 0x3c8   :  { %2709 = vmatpush1.bf16.msra.mxu1 %v3759_v15  ;;  %v3824_v15 = vcombine.high %v1125_v8, %v1129_v9  ;;  %v1138_v20 = vld [vmem:[#allocation12 + $0x6b8] sm:$0xff]  ;;  %v3825_v22 = vcombine.low %v1126_v11, %v1130_v12  ;;  %v4210_v8 = vld [vmem:[#allocation15 + $0x40] sm:$0xff]  }
 0x3c9   :  { %2791 = vmatpush1.bf16.msra.mxu0 %v3761_v16  ;;  %2710 = vmatprep.subr.bf16.mxu1 %v3768_v17  ;;  %v3826_v16 = vcombine.high %v1126_v11, %v1130_v12  ;;  %v1133_v17 = vld [vmem:[#allocation12 + $0x690] sm:$0xff]  ;;  %v3833_v31 = vcombine.low %v1134_v19, %v1138_v20  ;;  %v1174_v62 = vld [vmem:[#allocation12 + $0x7d8] sm:$0xff]  ;;  %v4211_v9 = vld [vmem:[#allocation15 + $0xc0] sm:$0xff]  }
 0x3ca   :  { %2792 = vmatprep.subr.bf16.mxu0 %v3770_v18  ;;  %v1137_v18 = vld [vmem:[#allocation12 + $0x6b0] sm:$0xff]  ;;  %v1178_v63 = vld [vmem:[#allocation12 + $0x7f8] sm:$0xff]  ;;  %v4212_v11 = vld [vmem:[#allocation15] sm:$0xff]  }
 0x3cb   :  { %v3831_v30 = vcombine.low %v1133_v17, %v1137_v18  ;;  %v4213_v12 = vld [vmem:[#allocation15 + $0x80] sm:$0xff]  }
 0x3cc   :  { %2711 = vmatpush1.bf16.msra.mxu1 %v3767_v23  ;;  %v3832_v23 = vcombine.high %v1133_v17, %v1137_v18  ;;  %v4218_v17 = vld [vmem:[#allocation15 + $0x50] sm:$0xff]  }
 0x3cd   :  { %2793 = vmatpush1.bf16.msra.mxu0 %v3769_v28  ;;  %2712 = vmatprep.subr.bf16.mxu1 %v3776_v24  ;;  %v3834_v28 = vcombine.high %v1134_v19, %v1138_v20  ;;  %v1141_v24 = vld [vmem:[#allocation12 + $0x6d0] sm:$0xff]  ;;  %v4219_v18 = vld [vmem:[#allocation15 + $0xd0] sm:$0xff]  }
 0x3ce   :  { %2794 = vmatprep.subr.bf16.mxu0 %v3778_v25  ;;  %v1145_v25 = vld [vmem:[#allocation12 + $0x6f0] sm:$0xff]  ;;  %v4220_v19 = vld [vmem:[#allocation15 + $0x10] sm:$0xff]  }
 0x3cf   :  { %v3839_v4 = vcombine.low %v1141_v24, %v1145_v25  ;;  %v4221_v20 = vld [vmem:[#allocation15 + $0x90] sm:$0xff]  }
 0x3d0   :  { %2713 = vmatpush1.bf16.msra.mxu1 %v3775_v35  ;;  %v3840_v35 = vcombine.high %v1141_v24, %v1145_v25  ;;  %v4227_v24 = vld [vmem:[#allocation15 + $0xe0] sm:$0xff]  }
 0x3d1   :  { %2795 = vmatpush1.bf16.msra.mxu0 %v3777_v32  ;;  %2714 = vmatprep.subr.bf16.mxu1 %v3784_v33  ;;  %v3842_v32 = vcombine.high %v1142_v26, %v1146_v29  ;;  %v1149_v33 = vld [vmem:[#allocation12 + $0x710] sm:$0xff]  ;;  %v4228_v25 = vld [vmem:[#allocation15 + $0x20] sm:$0xff]  }
 0x3d2   :  { %2796 = vmatprep.subr.bf16.mxu0 %v3786_v34  ;;  %v1153_v34 = vld [vmem:[#allocation12 + $0x730] sm:$0xff]  ;;  %v4229_v26 = vld [vmem:[#allocation15 + $0xa0] sm:$0xff]  }
 0x3d3   :  { %v3847_v45 = vcombine.low %v1149_v33, %v1153_v34  ;;  %v4230_v29 = vld [vmem:[#allocation15 + $0x68] sm:$0xff]  }
 0x3d4   :  { %2715 = vmatpush1.bf16.msra.mxu1 %v3783_v39  ;;  %v3848_v39 = vcombine.high %v1149_v33, %v1153_v34  ;;  %v4235_v33 = vld [vmem:[#allocation15 + $0xf0] sm:$0xff]  }
 0x3d5   :  { %2797 = vmatpush1.bf16.msra.mxu0 %v3785_v40  ;;  %2716 = vmatprep.subr.bf16.mxu1 %v3792_v41  ;;  %v3850_v40 = vcombine.high %v1150_v36, %v1154_v37  ;;  %v1157_v41 = vld [vmem:[#allocation12 + $0x750] sm:$0xff]  ;;  %v4236_v34 = vld [vmem:[#allocation15 + $0x30] sm:$0xff]   ;;  %v4238_v37 = vld [vmem:[#allocation15 + $0x78] sm:$0xff]  }
 0x3d6   :  { %2798 = vmatprep.subr.bf16.mxu0 %v3794_v42  ;;  %v1161_v42 = vld [vmem:[#allocation12 + $0x770] sm:$0xff]  ;;  %v4237_v36 = vld [vmem:[#allocation15 + $0xb0] sm:$0xff]  }
 0x3d7   :  { %v3855_v56 = vcombine.low %v1157_v41, %v1161_v42 }
 0x3d8   :  { %2717 = vmatpush1.bf16.msra.mxu1 %v3791_v10  ;;  %v3856_v10 = vcombine.high %v1157_v41, %v1161_v42  ;;  %v4243_v41 = vld [vmem:[#allocation15 + $0x1c0] sm:$0xff]   ;;  %v4749_v42 = vld [vmem:[#allocation13] sm:$0xff] }
 0x3d9   :  { %2799 = vmatpush1.bf16.msra.mxu0 %v3793_v50  ;;  %2718 = vmatprep.subr.bf16.mxu1 %v3800_v51  ;;  %v3858_v50 = vcombine.high %v1158_v43, %v1162_v44  ;;  %v1165_v51 = vld [vmem:[#allocation12 + $0x790] sm:$0xff]  ;;  %v1184_v43 = vrot.slane %v4749_v42, %v4698_v47  ;;  %v1192_v44 = vrot.slane %v4749_v42, %v503_v13 }
 0x3da   :  { %2800 = vmatprep.subr.bf16.mxu0 %v3802_v53  ;;  %v1169_v53 = vld [vmem:[#allocation12 + $0x7b0] sm:$0xff] }
 0x3db   :  { %v3863_v0 = vcombine.low %v1165_v51, %v1169_v53 }
 0x3dc   :  { %2719 = vmatpush1.bf16.msra.mxu1 %v3799_v58  ;;  %v3864_v58 = vcombine.high %v1165_v51, %v1169_v53 }
 0x3dd   :  { %2801 = vmatpush1.bf16.msra.mxu0 %v3801_v59  ;;  %2720 = vmatprep.subr.bf16.mxu1 %v3808_v60  ;;  %v3866_v59 = vcombine.high %v1166_v54, %v1170_v55  ;;  %v1173_v60 = vld [vmem:[#allocation12 + $0x7d0] sm:$0xff] }
 0x3de   :  { %2802 = vmatprep.subr.bf16.mxu0 %v3810_v61  ;;  %v1177_v61 = vld [vmem:[#allocation12 + $0x7f0] sm:$0xff] }
 0x3e0   :  { %2721 = vmatpush1.bf16.msra.mxu1 %v3807_v2  ;;  %v3872_v2 = vcombine.high %v1173_v60, %v1177_v61 }
 0x3e1   :  { %2803 = vmatpush1.bf16.msra.mxu0 %v3809_v3  ;;  %2722 = vmatprep.subr.bf16.mxu1 %v3816_v6  ;;  %v3874_v3 = vcombine.high %v1174_v62, %v1178_v63  ;;  %v3871_v6 = vcombine.low %v1173_v60, %v1177_v61 }
 0x3e2   :  { %2804 = vmatprep.subr.bf16.mxu0 %v3818_v7  ;;  %v3873_v7 = vcombine.low %v1174_v62, %v1178_v63 }
 0x3e4   :  { %2723 = vmatpush1.bf16.msra.mxu1 %v3815_v27  ;;  %v4214_v27 = vld [vmem:[#allocation15 + $0x48] sm:$0xff]  }
 0x3e5   :  { %2805 = vmatpush1.bf16.msra.mxu0 %v3817_v14  ;;  %2724 = vmatprep.subr.bf16.mxu1 %v3824_v15  ;;  %v4215_v14 = vld [vmem:[#allocation15 + $0xc8] sm:$0xff]  }
 0x3e6   :  { %2806 = vmatprep.subr.bf16.mxu0 %v3826_v16  ;;  %v4216_v15 = vld [vmem:[#allocation15 + $0x8] sm:$0xff]  }
 0x3e7   :  { %v4217_v16 = vld [vmem:[#allocation15 + $0x88] sm:$0xff]  }
 0x3e8   :  { %2725 = vmatpush1.bf16.msra.mxu1 %v3823_v21  ;;  %v4222_v21 = vld [vmem:[#allocation15 + $0x58] sm:$0xff]  }
 0x3e9   :  { %2807 = vmatpush1.bf16.msra.mxu0 %v3825_v22  ;;  %2726 = vmatprep.subr.bf16.mxu1 %v3832_v23  ;;  %v4223_v22 = vld [vmem:[#allocation15 + $0xd8] sm:$0xff]  }
 0x3ea   :  { %2808 = vmatprep.subr.bf16.mxu0 %v3834_v28  ;;  %v4224_v23 = vld [vmem:[#allocation15 + $0x18] sm:$0xff]   ;;  %v4226_v28 = vld [vmem:[#allocation15 + $0x60] sm:$0xff]  }
 0x3ec   :  { %2727 = vmatpush1.bf16.msra.mxu1 %v3831_v30  ;;  %v4231_v30 = vld [vmem:[#allocation15 + $0xe8] sm:$0xff]  }
 0x3ed   :  { %2809 = vmatpush1.bf16.msra.mxu0 %v3833_v31  ;;  %2728 = vmatprep.subr.bf16.mxu1 %v3840_v35  ;;  %v4232_v31 = vld [vmem:[#allocation15 + $0x28] sm:$0xff]  }
 0x3ee   :  { %2810 = vmatprep.subr.bf16.mxu0 %v3842_v32  ;;  %v4233_v35 = vld [vmem:[#allocation15 + $0xa8] sm:$0xff]   ;;  %v4234_v32 = vld [vmem:[#allocation15 + $0x70] sm:$0xff]  }
 0x3f0   :  { %2729 = vmatpush1.bf16.msra.mxu1 %v3839_v4  ;;  %v4239_v4 = vld [vmem:[#allocation15 + $0xf8] sm:$0xff]  }
 0x3f1   :  { %2811 = vmatpush1.bf16.msra.mxu0 %v3841_v38  ;;  %2730 = vmatprep.subr.bf16.mxu1 %v3848_v39  ;;  %v4240_v38 = vld [vmem:[#allocation15 + $0x38] sm:$0xff]  }
 0x3f2   :  { %2812 = vmatprep.subr.bf16.mxu0 %v3850_v40  ;;  %v4241_v39 = vld [vmem:[#allocation15 + $0xb8] sm:$0xff]   ;;  %v4242_v40 = vld [vmem:[#allocation15 + $0x140] sm:$0xff]  }
 0x3f4   :  { %2731 = vmatpush1.bf16.msra.mxu1 %v3847_v45  ;;  %v1188_v45 = vrot.slane %v4749_v42, %v4704_v49 }
 0x3f5   :  { %2813 = vmatpush1.bf16.msra.mxu0 %v3849_v48  ;;  %2732 = vmatprep.subr.bf16.mxu1 %v3856_v10  ;;  %v1196_v48 = vrot.slane %v4749_v42, %v507_v5  ;;  %v4245_v5 = vld [vmem:[#allocation15 + $0x180] sm:$0xff]  }
 0x3f6   :  { %2814 = vmatprep.subr.bf16.mxu0 %v3858_v50 }
 0x3f8   :  { %2733 = vmatpush1.bf16.msra.mxu1 %v3855_v56 }
 0x3f9   :  { %2815 = vmatpush1.bf16.msra.mxu0 %v3857_v57  ;;  %2734 = vmatprep.subr.bf16.mxu1 %v3864_v58 }
 0x3fa   :  { %2816 = vmatprep.subr.bf16.mxu0 %v3866_v59 }
 0x3fc   :  { %2735 = vmatpush1.bf16.msra.mxu1 %v3863_v0 }
 0x3fd   :  { %2817 = vmatpush1.bf16.msra.mxu0 %v3865_v1  ;;  %2736 = vmatprep.subr.bf16.mxu1 %v3872_v2  ;;  %v4244_v1 = vld [vmem:[#allocation15 + $0x100] sm:$0xff]  }
 0x3fe   :  { %2818 = vmatprep.subr.bf16.mxu0 %v3874_v3 }
 0x400   :  { %2737 = vmatpush1.bf16.msra.mxu1 %v3871_v6  ;;  %v4246_v6 = vld [vmem:[#allocation15 + $0x148] sm:$0xff]  }
 0x401   :  { %2819 = vmatpush1.bf16.msra.mxu0 %v3873_v7  ;;  %3944 = vmatprep.subr.bf16.mxu1 %v4210_v8  ;;  %v4247_v7 = vld [vmem:[#allocation15 + $0x1c8] sm:$0xff]  }
 0x402   :  { %3966 = vmatprep.subr.bf16.mxu0 %v4211_v9  ;;  %v4248_v8 = vld [vmem:[#allocation15 + $0x108] sm:$0xff]  }
 0x403   :  { %2739 = vmatmul.mubr.bf16.vlgmr.msra.gmra.mrb[16].mxu1 %v4737_v52  ;;  %v4249_v9 = vld [vmem:[#allocation15 + $0x188] sm:$0xff]  }
 0x404   :  { %2821 = vmatmul.mubr.bf16.vlgmr.msra.gmra.mrb[12].mxu0 %v4737_v52  ;;  %3945 = vmatpush3.bf16.msra.mxu1 %v4212_v11  ;;  %v4225_v52 = vld [vmem:[#allocation15 + $0x98] sm:$0xff]   ;;  %v4250_v11 = vld [vmem:[#allocation15 + $0x150] sm:$0xff]  }
 0x405   :  { %3967 = vmatpush3.bf16.msra.mxu0 %v4213_v12  ;;  %3946 = vmatprep.subr.bf16.mxu1 %v4214_v27  ;;  %v4251_v12 = vld [vmem:[#allocation15 + $0x1d0] sm:$0xff]  }
 0x406   :  { %3968 = vmatprep.subr.bf16.mxu0 %v4215_v14  ;;  %v4252_v27 = vld [vmem:[#allocation15 + $0x110] sm:$0xff]  }
 0x407   :  { %v4253_v14 = vld [vmem:[#allocation15 + $0x190] sm:$0xff]  }
 0x408   :  { %3947 = vmatpush3.bf16.msra.mxu1 %v4216_v15  ;;  %v4254_v15 = vld [vmem:[#allocation15 + $0x158] sm:$0xff]  }
 0x409   :  { %3969 = vmatpush3.bf16.msra.mxu0 %v4217_v16  ;;  %3948 = vmatprep.subr.bf16.mxu1 %v4218_v17  ;;  %v4255_v16 = vld [vmem:[#allocation15 + $0x1d8] sm:$0xff]  }
 0x40a   :  { %3970 = vmatprep.subr.bf16.mxu0 %v4219_v18  ;;  %v4256_v17 = vld [vmem:[#allocation15 + $0x118] sm:$0xff]  }
 0x40b   :  { %v4257_v18 = vld [vmem:[#allocation15 + $0x198] sm:$0xff]  }
 0x40c   :  { %3949 = vmatpush3.bf16.msra.mxu1 %v4220_v19  ;;  %v4258_v19 = vld [vmem:[#allocation15 + $0x160] sm:$0xff]  }
 0x40d   :  { %3971 = vmatpush3.bf16.msra.mxu0 %v4221_v20  ;;  %3950 = vmatprep.subr.bf16.mxu1 %v4222_v21  ;;  %v4259_v20 = vld [vmem:[#allocation15 + $0x1e0] sm:$0xff]  }
 0x40e   :  { %3972 = vmatprep.subr.bf16.mxu0 %v4223_v22  ;;  %v4260_v21 = vld [vmem:[#allocation15 + $0x120] sm:$0xff]  }
 0x40f   :  { %v4261_v22 = vld [vmem:[#allocation15 + $0x1a0] sm:$0xff]  }
 0x410   :  { %3951 = vmatpush3.bf16.msra.mxu1 %v4224_v23  ;;  %v4262_v23 = vld [vmem:[#allocation15 + $0x168] sm:$0xff]  }
 0x411   :  { %3973 = vmatpush3.bf16.msra.mxu0 %v4225_v52  ;;  %3952 = vmatprep.subr.bf16.mxu1 %v4226_v28  ;;  %v4263_v52 = vld [vmem:[#allocation15 + $0x1e8] sm:$0xff]  }
 0x412   :  { %3974 = vmatprep.subr.bf16.mxu0 %v4227_v24  ;;  %v4264_v28 = vld [vmem:[#allocation15 + $0x128] sm:$0xff]  }
 0x413   :  { %v4265_v24 = vld [vmem:[#allocation15 + $0x1a8] sm:$0xff]  }
 0x414   :  { %3953 = vmatpush3.bf16.msra.mxu1 %v4228_v25  ;;  %v4266_v25 = vld [vmem:[#allocation15 + $0x170] sm:$0xff]  }
 0x415   :  { %3975 = vmatpush3.bf16.msra.mxu0 %v4229_v26  ;;  %3954 = vmatprep.subr.bf16.mxu1 %v4230_v29  ;;  %v4267_v26 = vld [vmem:[#allocation15 + $0x1f0] sm:$0xff]  }
 0x416   :  { %3976 = vmatprep.subr.bf16.mxu0 %v4231_v30  ;;  %v4268_v29 = vld [vmem:[#allocation15 + $0x130] sm:$0xff]  }
 0x417   :  { %v4269_v30 = vld [vmem:[#allocation15 + $0x1b0] sm:$0xff]  }
 0x418   :  { %3955 = vmatpush3.bf16.msra.mxu1 %v4232_v31  ;;  %v4270_v31 = vld [vmem:[#allocation15 + $0x178] sm:$0xff]  }
 0x419   :  { %3977 = vmatpush3.bf16.msra.mxu0 %v4233_v35  ;;  %3956 = vmatprep.subr.bf16.mxu1 %v4234_v32  ;;  %v4271_v35 = vld [vmem:[#allocation15 + $0x1f8] sm:$0xff]  }
 0x41a   :  { %3978 = vmatprep.subr.bf16.mxu0 %v4235_v33  ;;  %v4272_v32 = vld [vmem:[#allocation15 + $0x138] sm:$0xff]  }
 0x41b   :  { %v4273_v33 = vld [vmem:[#allocation15 + $0x1b8] sm:$0xff]  }
 0x41c   :  { %3957 = vmatpush3.bf16.msra.mxu1 %v4236_v34  ;;  %v1199_v34 = vsub.s32 4, %v4695_v46 }
 0x41d   :  { %3979 = vmatpush3.bf16.msra.mxu0 %v4237_v36  ;;  %3958 = vmatprep.subr.bf16.mxu1 %v4238_v37  ;;  %v1207_v36 = vsub.s32 6, %v4695_v46  ;;  %v1203_v37 = vsub.s32 5, %v4695_v46 }
 0x41e   :  { %3980 = vmatprep.subr.bf16.mxu0 %v4239_v4  ;;  %v1211_v4 = vsub.s32 7, %v4695_v46 }
 0x420   :  { %3959 = vmatpush3.bf16.msra.mxu1 %v4240_v38  ;;  %v1200_v38 = vrot.slane %v4749_v42, %v1199_v34 }
 0x421   :  { %3981 = vmatpush3.bf16.msra.mxu0 %v4241_v39  ;;  %3988 = vmatprep.subr.bf16.mxu1 %v4242_v40  ;;  %v1208_v39 = vrot.slane %v4749_v42, %v1207_v36  ;;  %v1204_v40 = vrot.slane %v4749_v42, %v1203_v37 }
 0x422   :  { %4010 = vmatprep.subr.bf16.mxu0 %v4243_v41  ;;  %v1212_v41 = vrot.slane %v4749_v42, %v1211_v4 }
 0x456   :  { %v2576_v10 = vpop.f32.mrb[12].mxu1  ;;  %v2658_v50 = vpop.f32.mrb[8].mxu0 }
 0x457   :  { %v4044_v51 = vadd.f32 %v2576_v10, %v1184_v43  ;;  %v4046_v53 = vadd.f32 %v2658_v50, %v1192_v44  ;;  %v2578_v54 = vpop.f32.mrb[13].mxu1  ;;  %v2660_v55 = vpop.f32.mrb[9].mxu0 }
 0x458   :  { %v4045_v56 = vadd.f32 %v2578_v54, %v1188_v45  ;;  %v4047_v57 = vadd.f32 %v2660_v55, %v1196_v48  ;;  %v2580_v47 = vpop.f32.mrb[14].mxu1  ;;  %v2662_v58 = vpop.f32.mrb[10].mxu0 }
 0x459   :  { %v2829_v59 = vmax.f32 %v4044_v51, 0.0  ;;  %v2831_v60 = vmax.f32 %v4046_v53, 0.0  ;;  %v2581_v13 = vpop.f32.mrb[15].mxu1  ;;  %v2663_v61 = vpop.f32.mrb[11].mxu0 }
 0x45a   :  { %v2830_v62 = vmax.f32 %v4045_v56, 0.0  ;;  %v2832_v49 = vmax.f32 %v4047_v57, 0.0 }
 0x45b   :  { %v2837_v2 = vpack.c.bf16 %v2829_v59, %v2829_v59  ;;  %v2839_v3 = vpack.c.bf16 %v2831_v60, %v2831_v60 }
 0x45c   :  { %v2838_v63 = vpack.c.bf16 %v2830_v62, %v2830_v62  ;;  %v2840_v0 = vpack.c.bf16 %v2832_v49, %v2832_v49 }
 0x45e   :  { %3396 = vmatprep.mubr.bf16.mxu1 %v2838_v63  ;;  %3436 = vmatprep.mubr.bf16.mxu0 %v2840_v0  ;;  %v3875_v63 = vld [vmem:[%s4787_s12] ss:$0 sm:$0xff] }
 0x45f   :  { %3397 = vmatmul.mubr.bf16.vlgmr.msra.gmra.mrb[20].mxu1 %v2837_v2  ;;  %3437 = vmatmul.mubr.bf16.vlgmr.msra.gmra.mrb[16].mxu0 %v2839_v3 }
 0x460   :  { %3989 = vmatpush3.bf16.msra.mxu1 %v4244_v1  ;;  %4011 = vmatpush3.bf16.msra.mxu0 %v4245_v5 }
 0x461   :  { %3990 = vmatprep.subr.bf16.mxu1 %v4246_v6  ;;  %4012 = vmatprep.subr.bf16.mxu0 %v4247_v7 }
 0x464   :  { %3991 = vmatpush3.bf16.msra.mxu1 %v4248_v8  ;;  %4013 = vmatpush3.bf16.msra.mxu0 %v4249_v9 }
 0x465   :  { %3992 = vmatprep.subr.bf16.mxu1 %v4250_v11  ;;  %4014 = vmatprep.subr.bf16.mxu0 %v4251_v12 }
 0x468   :  { %3993 = vmatpush3.bf16.msra.mxu1 %v4252_v27  ;;  %4015 = vmatpush3.bf16.msra.mxu0 %v4253_v14 }
 0x469   :  { %3994 = vmatprep.subr.bf16.mxu1 %v4254_v15  ;;  %4016 = vmatprep.subr.bf16.mxu0 %v4255_v16 }
 0x46c   :  { %3995 = vmatpush3.bf16.msra.mxu1 %v4256_v17  ;;  %4017 = vmatpush3.bf16.msra.mxu0 %v4257_v18 }
 0x46d   :  { %3996 = vmatprep.subr.bf16.mxu1 %v4258_v19  ;;  %4018 = vmatprep.subr.bf16.mxu0 %v4259_v20 }
 0x470   :  { %3997 = vmatpush3.bf16.msra.mxu1 %v4260_v21  ;;  %4019 = vmatpush3.bf16.msra.mxu0 %v4261_v22 }
 0x471   :  { %3998 = vmatprep.subr.bf16.mxu1 %v4262_v23  ;;  %4020 = vmatprep.subr.bf16.mxu0 %v4263_v52 }
 0x474   :  { %3999 = vmatpush3.bf16.msra.mxu1 %v4264_v28  ;;  %4021 = vmatpush3.bf16.msra.mxu0 %v4265_v24 }
 0x475   :  { %4000 = vmatprep.subr.bf16.mxu1 %v4266_v25  ;;  %4022 = vmatprep.subr.bf16.mxu0 %v4267_v26 }
 0x478   :  { %4001 = vmatpush3.bf16.msra.mxu1 %v4268_v29  ;;  %4023 = vmatpush3.bf16.msra.mxu0 %v4269_v30 }
 0x479   :  { %4002 = vmatprep.subr.bf16.mxu1 %v4270_v31  ;;  %4024 = vmatprep.subr.bf16.mxu0 %v4271_v35 }
 0x47c   :  { %4003 = vmatpush3.bf16.msra.mxu1 %v4272_v32  ;;  %4025 = vmatpush3.bf16.msra.mxu0 %v4273_v33 }
 0x4d6   :  { %v2740_v43 = vpop.f32.mrb[16].mxu1 }
 0x4d7   :  { %v4048_v44 = vadd.f32 %v2740_v43, %v1200_v38  ;;  %v2822_v45 = vpop.f32.mrb[12].mxu0  ;;  %v2742_v48 = vpop.f32.mrb[17].mxu1 }
 0x4d8   :  { %v4050_v10 = vadd.f32 %v2822_v45, %v1208_v39  ;;  %v4049_v50 = vadd.f32 %v2742_v48, %v1204_v40  ;;  %v2824_v51 = vpop.f32.mrb[13].mxu0  ;;  %v2744_v53 = vpop.f32.mrb[18].mxu1 }
 0x4d9   :  { %v2833_v54 = vmax.f32 %v4048_v44, 0.0  ;;  %v4051_v55 = vadd.f32 %v2824_v51, %v1212_v41  ;;  %v2826_v56 = vpop.f32.mrb[14].mxu0  ;;  %v2745_v46 = vpop.f32.mrb[19].mxu1 }
 0x4da   :  { %v2835_v57 = vmax.f32 %v4050_v10, 0.0  ;;  %v2834_v47 = vmax.f32 %v4049_v50, 0.0  ;;  %v2827_v58 = vpop.f32.mrb[15].mxu0 }
 0x4db   :  { %v2836_v59 = vmax.f32 %v4051_v55, 0.0  ;;  %v2841_v13 = vpack.c.bf16 %v2833_v54, %v2833_v54 }
 0x4dc   :  { %v2842_v60 = vpack.c.bf16 %v2834_v47, %v2834_v47  ;;  %v2843_v42 = vpack.c.bf16 %v2835_v57, %v2835_v57 }
 0x4dd   :  { %v2844_v61 = vpack.c.bf16 %v2836_v59, %v2836_v59 }
 0x4de   :  { %3476 = vmatprep.mubr.bf16.mxu1 %v2842_v60 }
 0x4df   :  { %3516 = vmatprep.mubr.bf16.mxu0 %v2844_v61  ;;  %3477 = vmatmul.mubr.bf16.vlgmr.msra.gmra.mrb[24].mxu1 %v2841_v13 }
 0x4e0   :  { %3517 = vmatmul.mubr.bf16.vlgmr.msra.gmra.mrb[20].mxu0 %v2843_v42 }
 0x532   :  { %v3960_v62 = vpop.f32.mrb[20].mxu1  ;;  %v3982_v49 = vpop.f32.mrb[16].mxu0 }
 0x533   :  { %v3961_v0 = vpop.f32.mrb[21].mxu1  ;;  %v3983_v1 = vpop.f32.mrb[17].mxu0 }
 0x534   :  { %v3962_v5 = vadd.f32 %v3961_v0, %v3960_v62  ;;  %v3984_v2 = vadd.f32 %v3983_v1, %v3982_v49  ;;  %v3963_v3 = vpop.f32.mrb[22].mxu1  ;;  %v3985_v6 = vpop.f32.mrb[18].mxu0 }
 0x535   :  { %v3964_v7 = vpop.f32.mrb[23].mxu1  ;;  %v3986_v8 = vpop.f32.mrb[19].mxu0 }
 0x536   :  { %v3399_v9 = vadd.f32 %v3962_v5, %v3875_v63 }
 0x538   :  { %v3439_v11 = vadd.f32 %v3984_v2, %v3399_v9 }
 0x5b2   :  { %v4004_v12 = vpop.f32.mrb[24].mxu1 }
 0x5b3   :  { %v4026_v27 = vpop.f32.mrb[20].mxu0  ;;  %v4005_v14 = vpop.f32.mrb[25].mxu1 }
 0x5b4   :  { %v4006_v15 = vadd.f32 %v4005_v14, %v4004_v12  ;;  %v4027_v16 = vpop.f32.mrb[21].mxu0  ;;  %v4007_v17 = vpop.f32.mrb[26].mxu1 }
 0x5b5   :  { %v4028_v18 = vadd.f32 %v4027_v16, %v4026_v27  ;;  %v4029_v19 = vpop.f32.mrb[22].mxu0  ;;  %v4008_v20 = vpop.f32.mrb[27].mxu1 }
 0x5b6   :  { %v3479_v21 = vadd.f32 %v4006_v15, %v3439_v11  ;;  %v4030_v22 = vpop.f32.mrb[23].mxu0 }
 0x5b8   :  { %v3519_v23 = vadd.f32 %v4028_v18, %v3479_v21 }
 0x5ba   :  { %3524 = vst [vmem:[%s4788_s13] sm:$0xff] %v3519_v23 }
 0x5bb   :  { %3529 = vsyncpa [#allocation3], 1 }
 0x5bc   :  { %3530 = vsyncpa [#allocation5], 1 }
 0x5bd   :  { %3531 = vsyncpa [#allocation8], 1 }
 0x5be   :  { %3532 = vsyncpa [#allocation11], 1 }
 0x5bf   :  { %3533 = vsyncpa [#allocation14], 1 }

</bundles_post_ra>
